<compile_context>
chip_gen: v7x
topology: tpu7x:2x2x1
jax: 0.10.0
libtpu: 0.0.40
codegen_flags: <defaults>
</compile_context>

<pallas_src>
import jax
import jax.numpy as jnp
from jax.experimental import pallas as pl
from jax.experimental.pallas import tpu as pltpu

C_PAD = 128  # lane-dense padded class dimension


def _round_up(x, m):
    return ((x + m - 1) // m) * m


def _classifier_kernel(hidden_ref, mask_ref, onehot_ref, w_ref, b_ref,
                       logits_ref, nll_ref, sum_acc, denom_acc):
    """Grid = (batch_tiles, seq_tiles); seq axis (1) is the reduction axis."""
    s = pl.program_id(1)
    n_s = pl.num_programs(1)

    # ---- init accumulators on the first sequence tile of this batch tile ----
    @pl.when(s == 0)
    def _init():
        sum_acc[...] = jnp.zeros_like(sum_acc)
        denom_acc[...] = jnp.zeros_like(denom_acc)

    # ---- masked-sum accumulation (bf16 HBM stream, f32 accumulation) ----
    h = hidden_ref[...].astype(jnp.float32)                      # (TB, TS, H)
    m = mask_ref[...]                                            # (TB, TS) f32
    sum_acc[...] += jnp.sum(h * m[:, :, None], axis=1)           # (TB, H)
    denom_acc[...] += jnp.sum(m, axis=1, keepdims=True)          # (TB, 1)

    # ---- finalize on the last sequence tile ----
    @pl.when(s == n_s - 1)
    def _finalize():
        # mean pooling (torch.clamp(..., min=1e-9) semantics)
        pooled = sum_acc[...] / jnp.maximum(denom_acc[...], 1e-9)   # (TB, H)

        # linear projection on the MXU, lane-dense padded class dim
        z = jnp.dot(pooled, w_ref[...],
                    preferred_element_type=jnp.float32) + b_ref[...]  # (TB,128)

        # log_softmax (padded classes carry bias -1e30 -> exp underflows to 0)
        z_max = jnp.max(z, axis=-1, keepdims=True)
        shifted = z - z_max
        lse = jnp.log(jnp.sum(jnp.exp(shifted), axis=-1, keepdims=True))
        logp = shifted - lse                                          # (TB,128)
        logits_ref[...] = logp

        # per-row NLL via the (padded-safe) one-hot; broadcast across lanes so
        # the store stays unmasked / lane-dense.
        nll_rows = -jnp.sum(logp * onehot_ref[...], axis=-1, keepdims=True)
        nll_ref[...] = jnp.broadcast_to(nll_rows, logp.shape)


def literal_idiomatic_classifier_forward(hidden_states, phrase_masks,
                                         proj_weight, proj_bias, labels,
                                         *, tb=8, ts=None):
    """hidden_states: (B,S,H); phrase_masks: (B,S);
       proj_weight: (C,H) (PyTorch nn.Linear layout); proj_bias: (C,);
       labels: (B,) int.  Returns (loss scalar, logits (B,C))."""
    B, S, H = hidden_states.shape
    C = proj_weight.shape[0]
    assert C <= C_PAD

    # ---- tile sizing: TS is a multiple of 128 (lane/sublane alignment);
    #      adapt TS to H so one bf16 hidden tile stays ~<=4 MiB, keeping the
    #      double-buffered working set well inside v7x's 64 MiB VMEM. ----
    if ts is None:
        budget_bytes = 4 * 1024 * 1024
        ts_cap = max(128, (budget_bytes // (tb * H * 2)) // 128 * 128)
        ts = min(ts_cap, _round_up(S, 128))
    ts = max(128, _round_up(ts, 128))
    s_pad = _round_up(S, ts)
    b_pad = _round_up(B, tb)
    n_bt, n_st = b_pad // tb, s_pad // ts

    # ---- host-side packing / padding ----
    # bf16 for the big stream; padded seq positions get mask==0 so they never
    # contribute to the pooled sum or the denominator.
    h = jnp.pad(hidden_states.astype(jnp.bfloat16),
                ((0, b_pad - B), (0, s_pad - S), (0, 0)))
    m = jnp.pad(phrase_masks.astype(jnp.float32),
                ((0, b_pad - B), (0, s_pad - S)))

    # projection weight pre-transposed and zero-padded to 128 classes;
    # padded classes get a huge negative bias so log_softmax ignores them.
    w_t = jnp.zeros((H, C_PAD), jnp.float32).at[:, :C].set(
        jnp.transpose(proj_weight).astype(jnp.float32))
    b2 = jnp.full((1, C_PAD), -1e30, dtype=jnp.float32).at[:, :C].set(
        proj_bias.astype(jnp.float32).reshape(1, C))

    # lane-dense one-hot labels; padded batch rows are all-zero -> NLL 0.
    onehot = jax.nn.one_hot(labels.astype(jnp.int32), C_PAD, dtype=jnp.float32)
    onehot = jnp.pad(onehot, ((0, b_pad - B), (0, 0)))

    grid = (n_bt, n_st)

    grid_spec = pltpu.PrefetchScalarGridSpec(
        num_scalar_prefetch=0,
        grid=grid,
        in_specs=[
            pl.BlockSpec((tb, ts, H), lambda b, s: (b, s, 0)),   # hidden (bf16)
            pl.BlockSpec((tb, ts), lambda b, s: (b, s)),         # mask
            pl.BlockSpec((tb, C_PAD), lambda b, s: (b, 0)),      # one-hot labels
            pl.BlockSpec((H, C_PAD), lambda b, s: (0, 0)),       # weight (resident)
            pl.BlockSpec((1, C_PAD), lambda b, s: (0, 0)),       # bias (resident)
        ],
        out_specs=(
            pl.BlockSpec((tb, C_PAD), lambda b, s: (b, 0)),      # padded log-probs
            pl.BlockSpec((tb, C_PAD), lambda b, s: (b, 0)),      # per-row NLL slab
        ),
        scratch_shapes=[
            pltpu.VMEM((tb, H), jnp.float32),   # masked-sum accumulator
            pltpu.VMEM((tb, 1), jnp.float32),   # mask-count accumulator
        ],
    )

    cost = pl.CostEstimate(
        flops=2 * b_pad * s_pad * H + 2 * b_pad * H * C_PAD,
        transcendentals=b_pad * C_PAD + b_pad,
        bytes_accessed=(h.size * 2 + m.size * 4 + onehot.size * 4
                        + w_t.size * 4 + b2.size * 4 + 2 * b_pad * C_PAD * 4),
    )

    logits_pad, nll_pad = pl.pallas_call(
        _classifier_kernel,
        out_shape=(
            jax.ShapeDtypeStruct((b_pad, C_PAD), jnp.float32),
            jax.ShapeDtypeStruct((b_pad, C_PAD), jnp.float32),
        ),
        grid_spec=grid_spec,
        compiler_params=pltpu.CompilerParams(
            dimension_semantics=("parallel", "arbitrary"),
            vmem_limit_bytes=40 * 1024 * 1024,
        ),
        cost_estimate=cost,
    )(h, m, onehot, w_t, b2)

    # padded batch rows carry NLL == 0, so a plain sum / true-B is the exact
    # mean over the real batch (matches nn.NLLLoss mean reduction).
    loss = jnp.sum(nll_pad[:, 0]) / B
    logits = logits_pad[:B, :C]
    return loss, logits


def _reference_forward(hidden_states, phrase_masks, proj_weight, proj_bias,
                       labels):
    """Pure-JAX reference mirroring the PyTorch forward, for sanity check."""
    h = hidden_states.astype(jnp.float32)
    m = phrase_masks.astype(jnp.float32)[:, :, None]
    pooled = jnp.sum(h * m, axis=1) / jnp.clip(jnp.sum(m, axis=1), 1e-9, None)
    z = pooled @ jnp.transpose(proj_weight).astype(jnp.float32) + proj_bias
    logp = jax.nn.log_softmax(z, axis=-1)
    loss = -jnp.mean(logp[jnp.arange(labels.shape[0]), labels])
    return loss, logp


if __name__ == "__main__":
    key = jax.random.PRNGKey(0)
    k_hidden, k_mask, k_w, k_b, k_lab = jax.random.split(key, 5)

    # Small shapes consistent with the module's forward; large enough to
    # exercise multiple batch tiles (B=10 -> pad 16) and multiple seq tiles
    # (S=200 -> pad 256, TS=128), including padded-row / padded-position paths.
    B, S, H, C = 10, 200, 32, 3  # batch, seq, PRETRAINED_HIDDEN_SIZE, CLS_LI_NUM_CLASSES

    # "adapter" hidden-state stand-in (bf16, as the kernel streams them)
    hidden_states = jax.random.normal(
        k_hidden, (B, S, H), dtype=jnp.float32).astype(jnp.bfloat16)

    # phrase masks: binary, guarantee at least one active token per row
    phrase_masks = (jax.random.uniform(k_mask, (B, S)) > 0.5).astype(jnp.float32)
    phrase_masks = phrase_masks.at[:, 0].set(1.0)

    # projection layer params (nn.Linear(H, C)): weight (C, H), bias (C,)
    proj_weight = jax.random.normal(k_w, (C, H), dtype=jnp.float32) * 0.05
    proj_bias = jax.random.normal(k_b, (C,), dtype=jnp.float32) * 0.01

    labels = jax.random.randint(k_lab, (B,), 0, C, dtype=jnp.int32)

    loss, logits = literal_idiomatic_classifier_forward(
        hidden_states, phrase_masks, proj_weight, proj_bias, labels, ts=128)
    jax.block_until_ready((loss, logits))

    # sanity check against pure-JAX reference (same bf16 inputs, f32 math)
    ref_loss, ref_logits = _reference_forward(
        hidden_states, phrase_masks, proj_weight, proj_bias, labels)
    assert jnp.allclose(loss, ref_loss, atol=3e-5), (loss, ref_loss)
    assert jnp.allclose(logits, ref_logits, atol=3e-5), (
        float(jnp.max(jnp.abs(logits - ref_logits))))

    print("KERNEL_OK")
</pallas_src>

<mosaic_0001>
module attributes {stable_mosaic.version = 11 : i64} {
  func.func @_classifier_kernel(%arg0: i32, %arg1: i32, %arg2: memref<8x128x32xbf16, #tpu.memory_space<vmem>>, %arg3: memref<8x128xf32, #tpu.memory_space<vmem>>, %arg4: memref<8x128xf32, #tpu.memory_space<vmem>>, %arg5: memref<32x128xf32, #tpu.memory_space<vmem>>, %arg6: memref<1x128xf32, #tpu.memory_space<vmem>>, %arg7: memref<8x128xf32, #tpu.memory_space<vmem>>, %arg8: memref<8x128xf32, #tpu.memory_space<vmem>>, %arg9: memref<8x32xf32, #tpu.memory_space<vmem>>, %arg10: memref<8x1xf32, #tpu.memory_space<vmem>>) attributes {dimension_semantics = [#tpu.dimension_semantics<parallel>, #tpu.dimension_semantics<arbitrary>], iteration_bounds = array<i64: 2, 2>, scalar_prefetch = 0 : i64, scratch_operands = 2 : i64, tpu.core_type = #tpu.core_type<tc>, window_params = [{transform_indices = @transform_0, window_bounds = array<i64: 8, 128, 32>}, {transform_indices = @transform_1, window_bounds = array<i64: 8, 128>}, {transform_indices = @transform_2, window_bounds = array<i64: 8, 128>}, {pipeline_mode = #tpu.pipeline_mode<synchronous>, transform_indices = @transform_3, window_bounds = array<i64: 32, 128>}, {pipeline_mode = #tpu.pipeline_mode<synchronous>, transform_indices = @transform_4, window_bounds = array<i64: 1, 128>}, {transform_indices = @transform_5, window_bounds = array<i64: 8, 128>}, {transform_indices = @transform_6, window_bounds = array<i64: 8, 128>}]} {
    %c0_i32 = arith.constant 0 : i32
    %0 = arith.cmpi eq, %arg1, %c0_i32 : i32
    %1 = arith.extui %0 : i1 to i32
    %c0_i32_0 = arith.constant 0 : i32
    %2 = arith.cmpi ne, %1, %c0_i32_0 : i32
    scf.if %2 {
      %cst_15 = arith.constant 0.000000e+00 : f32
      %21 = vector.broadcast %cst_15 : f32 to vector<8x32xf32>
      %c0_16 = arith.constant 0 : index
      %c0_17 = arith.constant 0 : index
      %22 = vector.load %arg9[%c0_16, %c0_17] : memref<8x32xf32, #tpu.memory_space<vmem>>, vector<8x32xf32>
      tpu.vector_store %arg9[%c0_16, %c0_17], %21 {strides = array<i32>} : memref<8x32xf32, #tpu.memory_space<vmem>>, vector<8x32xf32>,
      %cst_18 = arith.constant 0.000000e+00 : f32
      %23 = vector.broadcast %cst_18 : f32 to vector<8x1xf32>
      %c0_19 = arith.constant 0 : index
      %c0_20 = arith.constant 0 : index
      %24 = vector.load %arg10[%c0_19, %c0_20] : memref<8x1xf32, #tpu.memory_space<vmem>>, vector<8x1xf32>
      tpu.vector_store %arg10[%c0_19, %c0_20], %23 {strides = array<i32>} : memref<8x1xf32, #tpu.memory_space<vmem>>, vector<8x1xf32>,
    } else {
    }
    %c0 = arith.constant 0 : index
    %c0_1 = arith.constant 0 : index
    %c0_2 = arith.constant 0 : index
    %3 = vector.load %arg2[%c0, %c0_1, %c0_2] : memref<8x128x32xbf16, #tpu.memory_space<vmem>>, vector<8x128x32xbf16>
    %4 = arith.extf %3 : vector<8x128x32xbf16> to vector<8x128x32xf32>
    %c0_3 = arith.constant 0 : index
    %c0_4 = arith.constant 0 : index
    %5 = vector.load %arg3[%c0_3, %c0_4] : memref<8x128xf32, #tpu.memory_space<vmem>>, vector<8x128xf32>
    %c0_5 = arith.constant 0 : index
    %c0_6 = arith.constant 0 : index
    %6 = vector.load %arg9[%c0_5, %c0_6] : memref<8x32xf32, #tpu.memory_space<vmem>>, vector<8x32xf32>
    %7 = vector.shape_cast %5 : vector<8x128xf32> to vector<8x128x1xf32>
    %8 = vector.broadcast %7 : vector<8x128x1xf32> to vector<8x128x32xf32>
    %9 = arith.mulf %4, %8 : vector<8x128x32xf32>
    %cst = arith.constant dense<0.000000e+00> : vector<8x32xf32>
    %10 = vector.multi_reduction <add>, %9, %cst [1] : vector<8x128x32xf32> to vector<8x32xf32>
    %11 = arith.addf %6, %10 : vector<8x32xf32>
    %c0_7 = arith.constant 0 : index
    %c0_8 = arith.constant 0 : index
    %12 = vector.load %arg9[%c0_7, %c0_8] : memref<8x32xf32, #tpu.memory_space<vmem>>, vector<8x32xf32>
    tpu.vector_store %arg9[%c0_7, %c0_8], %11 {strides = array<i32>} : memref<8x32xf32, #tpu.memory_space<vmem>>, vector<8x32xf32>,
    %c0_9 = arith.constant 0 : index
    %c0_10 = arith.constant 0 : index
    %13 = vector.load %arg10[%c0_9, %c0_10] : memref<8x1xf32, #tpu.memory_space<vmem>>, vector<8x1xf32>
    %cst_11 = arith.constant dense<0.000000e+00> : vector<8xf32>
    %14 = vector.multi_reduction <add>, %5, %cst_11 [1] : vector<8x128xf32> to vector<8xf32>
    %15 = vector.shape_cast %14 : vector<8xf32> to vector<8x1xf32>
    %16 = arith.addf %13, %15 : vector<8x1xf32>
    %c0_12 = arith.constant 0 : index
    %c0_13 = arith.constant 0 : index
    %17 = vector.load %arg10[%c0_12, %c0_13] : memref<8x1xf32, #tpu.memory_space<vmem>>, vector<8x1xf32>
    tpu.vector_store %arg10[%c0_12, %c0_13], %16 {strides = array<i32>} : memref<8x1xf32, #tpu.memory_space<vmem>>, vector<8x1xf32>,
    %c1_i32 = arith.constant 1 : i32
    %18 = arith.cmpi eq, %arg1, %c1_i32 : i32
    %19 = arith.extui %18 : i1 to i32
    %c0_i32_14 = arith.constant 0 : i32
    %20 = arith.cmpi ne, %19, %c0_i32_14 : i32
    scf.if %20 {
      %c0_15 = arith.constant 0 : index
      %c0_16 = arith.constant 0 : index
      %21 = vector.load %arg9[%c0_15, %c0_16] : memref<8x32xf32, #tpu.memory_space<vmem>>, vector<8x32xf32>
      %c0_17 = arith.constant 0 : index
      %c0_18 = arith.constant 0 : index
      %22 = vector.load %arg10[%c0_17, %c0_18] : memref<8x1xf32, #tpu.memory_space<vmem>>, vector<8x1xf32>
      %cst_19 = arith.constant 9.99999971E-10 : f32
      %23 = vector.broadcast %cst_19 : f32 to vector<8x1xf32>
      %24 = arith.maximumf %22, %23 : vector<8x1xf32>
      %25 = vector.broadcast %24 : vector<8x1xf32> to vector<8x32xf32>
      %26 = arith.divf %21, %25 : vector<8x32xf32>
      %c0_20 = arith.constant 0 : index
      %c0_21 = arith.constant 0 : index
      %27 = vector.load %arg5[%c0_20, %c0_21] : memref<32x128xf32, #tpu.memory_space<vmem>>, vector<32x128xf32>
      %cst_22 = arith.constant dense<0.000000e+00> : vector<8x128xf32>
      %28 = tpu.matmul %26, %27, %cst_22 {dimension_numbers = #tpu.dot_dimension_numbers<[1], [0], [0], [1], [0, 0, 1, 1], [], []>} : vector<8x32xf32>, vector<32x128xf32>, vector<8x128xf32> -> vector<8x128xf32>
      %c0_23 = arith.constant 0 : index
      %c0_24 = arith.constant 0 : index
      %29 = vector.load %arg6[%c0_23, %c0_24] : memref<1x128xf32, #tpu.memory_space<vmem>>, vector<1x128xf32>
      %30 = vector.broadcast %29 : vector<1x128xf32> to vector<8x128xf32>
      %31 = arith.addf %28, %30 : vector<8x128xf32>
      %cst_25 = arith.constant dense<0xFF800000> : vector<8xf32>
      %32 = vector.multi_reduction <maximumf>, %31, %cst_25 [1] : vector<8x128xf32> to vector<8xf32>
      %33 = vector.shape_cast %32 : vector<8xf32> to vector<8x1xf32>
      %34 = vector.broadcast %33 : vector<8x1xf32> to vector<8x128xf32>
      %35 = arith.subf %31, %34 : vector<8x128xf32>
      %36 = math.exp %35 : vector<8x128xf32>
      %cst_26 = arith.constant dense<0.000000e+00> : vector<8xf32>
      %37 = vector.multi_reduction <add>, %36, %cst_26 [1] : vector<8x128xf32> to vector<8xf32>
      %38 = vector.shape_cast %37 : vector<8xf32> to vector<8x1xf32>
      %39 = math.log %38 : vector<8x1xf32>
      %40 = vector.broadcast %39 : vector<8x1xf32> to vector<8x128xf32>
      %41 = arith.subf %35, %40 : vector<8x128xf32>
      %c0_27 = arith.constant 0 : index
      %c0_28 = arith.constant 0 : index
      %42 = vector.load %arg7[%c0_27, %c0_28] : memref<8x128xf32, #tpu.memory_space<vmem>>, vector<8x128xf32>
      tpu.vector_store %arg7[%c0_27, %c0_28], %41 {strides = array<i32>} : memref<8x128xf32, #tpu.memory_space<vmem>>, vector<8x128xf32>,
      %c0_29 = arith.constant 0 : index
      %c0_30 = arith.constant 0 : index
      %43 = vector.load %arg4[%c0_29, %c0_30] : memref<8x128xf32, #tpu.memory_space<vmem>>, vector<8x128xf32>
      %44 = arith.mulf %41, %43 : vector<8x128xf32>
      %cst_31 = arith.constant dense<0.000000e+00> : vector<8xf32>
      %45 = vector.multi_reduction <add>, %44, %cst_31 [1] : vector<8x128xf32> to vector<8xf32>
      %46 = vector.shape_cast %45 : vector<8xf32> to vector<8x1xf32>
      %cst_32 = arith.constant 0.000000e+00 : f32
      %47 = vector.broadcast %cst_32 : f32 to vector<8x1xf32>
      %48 = arith.subf %47, %46 : vector<8x1xf32>
      %49 = vector.shape_cast %48 : vector<8x1xf32> to vector<8x1xf32>
      %50 = vector.broadcast %49 : vector<8x1xf32> to vector<8x128xf32>
      %c0_33 = arith.constant 0 : index
      %c0_34 = arith.constant 0 : index
      %51 = vector.load %arg8[%c0_33, %c0_34] : memref<8x128xf32, #tpu.memory_space<vmem>>, vector<8x128xf32>
      tpu.vector_store %arg8[%c0_33, %c0_34], %50 {strides = array<i32>} : memref<8x128xf32, #tpu.memory_space<vmem>>, vector<8x128xf32>,
    } else {
    }
    return
  }
  func.func @transform_0(%arg0: i32, %arg1: i32) -> (i32, i32, i32) {
    %c0_i32 = arith.constant 0 : i32
    %c0_i32_0 = arith.constant 0 : i32
    return %arg0, %arg1, %c0_i32 : i32, i32, i32
  }
  func.func @transform_1(%arg0: i32, %arg1: i32) -> (i32, i32) {
    %c0_i32 = arith.constant 0 : i32
    return %arg0, %arg1 : i32, i32
  }
  func.func @transform_2(%arg0: i32, %arg1: i32) -> (i32, i32) {
    %c0_i32 = arith.constant 0 : i32
    %c0_i32_0 = arith.constant 0 : i32
    return %arg0, %c0_i32 : i32, i32
  }
  func.func @transform_3(%arg0: i32, %arg1: i32) -> (i32, i32) {
    %c0_i32 = arith.constant 0 : i32
    %c0_i32_0 = arith.constant 0 : i32
    %c0_i32_1 = arith.constant 0 : i32
    return %c0_i32, %c0_i32_0 : i32, i32
  }
  func.func @transform_4(%arg0: i32, %arg1: i32) -> (i32, i32) {
    %c0_i32 = arith.constant 0 : i32
    %c0_i32_0 = arith.constant 0 : i32
    %c0_i32_1 = arith.constant 0 : i32
    return %c0_i32, %c0_i32_0 : i32, i32
  }
  func.func @transform_5(%arg0: i32, %arg1: i32) -> (i32, i32) {
    %c0_i32 = arith.constant 0 : i32
    %c0_i32_0 = arith.constant 0 : i32
    return %arg0, %c0_i32 : i32, i32
  }
  func.func @transform_6(%arg0: i32, %arg1: i32) -> (i32, i32) {
    %c0_i32 = arith.constant 0 : i32
    %c0_i32_0 = arith.constant 0 : i32
    return %arg0, %c0_i32 : i32, i32
  }
}

</mosaic_0001>

<bundles_post_ra>
// kernel: tpu_custom_call.1
= control target key start
LH: loop header
LB: loop body
LE: loop exit
PB: predicated region body
PF: predicated region fallthrough
CT: control target
= control target key end

     0   :  { %s4053_s0 = inlined_call_operand.vmem [shape: bf16[16,256,32], index: 0, kind: input, shape index: {}]   ;;  %s4054_s1 = inlined_call_operand.vmem [shape: f32[16,256], index: 1, kind: input, shape index: {}]   ;;  %s4055_s2 = inlined_call_operand.vmem [shape: f32[16,128], index: 2, kind: input, shape index: {}]   ;;  %s4056_s3 = inlined_call_operand.vmem [shape: f32[32,128], index: 3, kind: input, shape index: {}]   ;;  %s4057_s4 = inlined_call_operand.vmem [shape: f32[1,128], index: 4, kind: input, shape index: {}]   ;;  %s4058_s5 = inlined_call_operand.hbm [shape: f32[16,128], index: 5, kind: output, shape index: {0}]   ;;  %s4059_s6 = inlined_call_operand.hbm [shape: f32[16,128], index: 6, kind: output, shape index: {1}]  }
   0x1   :  { %4066 = sst [smem:[#allocation20_spill]] %s4053_s0 }
   0x2   :  { %12 = vsyncpa [#allocation6], 0 }
   0x3   :  { %14 = vsyncpa [#allocation6 + $0x1], 0 }
   0x4   :  { %15 = vsyncpa [#allocation8], 0 }
   0x5   :  { %17 = vsyncpa [#allocation8 + $0x1], 0  ;;  %s3083_s21 = smov 0   ;;  %s3085_s22 = smov 0  }
   0x6   :  { %s3087_s23 = smov 0   ;;  %s3089_s24 = smov 0  }
   0x7   :  { %s3091_s25 = smov 0   ;;  %s3093_s26 = smov 0  }
   0x8   :  { %s3095_s27 = smov 0   ;;  %s3097_s28 = smov 0  }
   0x9   :  { %s3099_s29 = smov 0   ;;  %s3101_s30 = smov 0  }
   0xa LB: > { %4067 = sst [smem:[#allocation11_spill]] %s3011_s23  ;;  %s2424_s7 = sadd.s32 4294967295, %s3039_s30   ;;  %s3039_s30 = sphi %s3101_s30, %s23_s30   ;;  %s3035_s29 = sphi %s3099_s29, %s4125_s29   ;;  %s3031_s28 = sphi %s3097_s28, %s4124_s28   ;;  %s3027_s27 = sphi %s3095_s27, %s4123_s27   ;;  %s3023_s26 = sphi %s3093_s26, %s4122_s26   ;;  %s3019_s25 = sphi %s3091_s25, %s4121_s25   ;;  %s3015_s24 = sphi %s3089_s24, %s4120_s24   ;;  %s3011_s23 = sphi %s3087_s23, %s4119_s23   ;;  %s3007_s22 = sphi %s3085_s22, %s4127_s22   ;;  %s3003_s21 = sphi %s3083_s21, %s4126_s21  }
   0xb   : > { %4068 = sst [smem:[#allocation12_spill]] %s3019_s25  ;;  %s2425_s8 = sadd.s32 4294967294, %s3039_s30  }
   0xc   : > { %4069 = sst [smem:[#allocation13_spill]] %s3031_s28  ;;  %s32_s9 = sadd.s32 1, %s3031_s28 }
   0xd   : > { %4070 = sst [smem:[#allocation14_spill]] %s3035_s29  ;;  %s35_s10 = sadd.s32 1, %s3035_s29 }
   0xe   : > { %p33_p0 = scmp.ge.s32.totalorder %s32_s9, 2  ;;  %s44_s11 = sadd.s32 1, %s3019_s25 }
   0xf   : > { %p51_p1 = scmp.ne.s32.totalorder %s3019_s25, %s3015_s24  ;;  %p52_p2 = scmp.eq.s32.totalorder %s3039_s30, 0 }
  0x10   : > { %s4129_s9 = smov (%p33_p0, %s32_s9), 0  ;;  %s4131_s10 = smov (!%p33_p0, %s35_s10), %s3035_s29 }
  0x11   : > { %4071 = sst [smem:[#allocation15_spill]] %s4129_s9  ;;  %s40_s12 = ssub.s32 %s3031_s28, %s4129_s9 }
  0x12   : > { %p3146_p3 = por %p52_p2, %p51_p1  ;;  %p37_p4 = scmp.ge.s32.totalorder %s4131_s10, 2 }
  0x13   : > { %s166_s14 = sadd.s32 1, %s3011_s23  ;;  %p176_p5 = scmp.ne.s32.totalorder %s3011_s23, %s3007_s22 }
  0x14   : > { %p177_p6 = scmp.eq.s32.totalorder %s2424_s7, 3  ;;  %s4133_s10 = smov (%p37_p4, %s4131_s10), 0 }
  0x15   : > { %4073 = sst [smem:[#allocation16_spill]] %s4133_s10  ;;  %p182_p8 = scmp.ne.s32.totalorder %s3007_s22, %s3003_s21 }
  0x16   : > { %p3155_p7 = por %p177_p6, %p176_p5  ;;  %s39_s16 = ssub.s32 %s3035_s29, %s4133_s10 }
  0x17   : > { %p183_p9 = scmp.eq.s32.totalorder %s2425_s8, 3  ;;  %s41_s17 = sor.u32 %s40_s12, %s39_s16 }
  0x18   : > { %p164_p10 = scmp.eq.s32.totalorder %s39_s16, 0  ;;  %p42_p11 = scmp.eq.s32.totalorder %s41_s17, 0 }
  0x19   : > { %p3163_p12 = por %p183_p9, %p182_p8  ;;  %p2427_p13 = scmp.ge.s32.totalorder %s3039_s30, 4 }
  0x1a   : > { %s3168_s19 = scalar_select %p164_p10, %s3011_s23, %s166_s14  }
  0x1b   : > { %s3171_s20 = scalar_select %p42_p11, %s3019_s25, %s44_s11  }
  0x1c   : > { %4076 = sst [smem:[#allocation17_spill]] %s3168_s19  ;;  %231 = sbr.rel (%p2427_p13) target bundleno = 77 (0x4d), region = 24 }
  0x1d   : > { %4077 = sst [smem:[#allocation18_spill]] %s3171_s20 }
  0x23   : > { %234 = sbr.rel (!%p3146_p3) target bundleno = 77 (0x4d), region = 28  ;;  %s236_s7 = sand.u32 (%p3146_p3), 1, %s3019_s25  }
  0x24   : > { %s2430_s8 = sshll.u32 (%p3146_p3), %s3031_s28, 4  ;;  %s2428_s12 = sshll.u32 (%p3146_p3), %s236_s7, 9 }
  0x25   : > { %s2450_s16 = sshll.u32 (%p3146_p3), %s3035_s29, 8  ;;  %s4078_s0 = sld [smem:[#allocation20_spill]] (%p3146_p3) }
  0x26   : > { %s242_s17 = sadd.s32 (%p3146_p3), %s2450_s16, %s2430_s8  ;;  %s3187_s13 = scalar_lea.vmem (%p3146_p3), [#allocation4], %s2428_s12 }
  0x27   : > { %s2432_s10 = sshll.u32 (%p3146_p3), %s242_s17, 2 }
  0x2b   : > { %s3182_s11 = scalar_lea.vmem %s4078_s0, %s2432_s10 }
  0x2c   : > { %v260_v0 = vld [vmem:[%s3182_s11] sm:$0xff]   ;;  %v264_v1 = vld [vmem:[%s3182_s11 + $0x8] sm:$0xff]   ;;  %v268_v2 = vld [vmem:[%s3182_s11 + $0x10] sm:$0xff]  }
  0x2d   : > { %261 = vst [vmem:[%s3187_s13] sm:$0xff] %v260_v0   ;;  %265 = vst [vmem:[%s3187_s13 + $0x8] sm:$0xff] %v264_v1   ;;  %v272_v3 = vld [vmem:[%s3182_s11 + $0x18] sm:$0xff]   ;;  %v276_v4 = vld [vmem:[%s3182_s11 + $0x20] sm:$0xff]  }
  0x2e   : > { %269 = vst [vmem:[%s3187_s13 + $0x10] sm:$0xff] %v268_v2   ;;  %v280_v5 = vld [vmem:[%s3182_s11 + $0x28] sm:$0xff]   ;;  %273 = vst [vmem:[%s3187_s13 + $0x18] sm:$0xff] %v272_v3   ;;  %v284_v6 = vld [vmem:[%s3182_s11 + $0x30] sm:$0xff]  }
  0x2f   : > { %277 = vst [vmem:[%s3187_s13 + $0x20] sm:$0xff] %v276_v4   ;;  %281 = vst [vmem:[%s3187_s13 + $0x28] sm:$0xff] %v280_v5   ;;  %v288_v7 = vld [vmem:[%s3182_s11 + $0x38] sm:$0xff]   ;;  %v292_v8 = vld [vmem:[%s3182_s11 + $0x80] sm:$0xff]  }
  0x30   : > { %285 = vst [vmem:[%s3187_s13 + $0x30] sm:$0xff] %v284_v6   ;;  %289 = vst [vmem:[%s3187_s13 + $0x38] sm:$0xff] %v288_v7   ;;  %v296_v9 = vld [vmem:[%s3182_s11 + $0x88] sm:$0xff]   ;;  %v300_v10 = vld [vmem:[%s3182_s11 + $0x90] sm:$0xff]  }
  0x31   : > { %293 = vst [vmem:[%s3187_s13 + $0x40] sm:$0xff] %v292_v8   ;;  %v304_v11 = vld [vmem:[%s3182_s11 + $0x98] sm:$0xff]   ;;  %297 = vst [vmem:[%s3187_s13 + $0x48] sm:$0xff] %v296_v9   ;;  %v308_v12 = vld [vmem:[%s3182_s11 + $0xa0] sm:$0xff]  }
  0x32   : > { %301 = vst [vmem:[%s3187_s13 + $0x50] sm:$0xff] %v300_v10   ;;  %305 = vst [vmem:[%s3187_s13 + $0x58] sm:$0xff] %v304_v11   ;;  %v312_v13 = vld [vmem:[%s3182_s11 + $0xa8] sm:$0xff]   ;;  %v316_v14 = vld [vmem:[%s3182_s11 + $0xb0] sm:$0xff]  }
  0x33   : > { %309 = vst [vmem:[%s3187_s13 + $0x60] sm:$0xff] %v308_v12   ;;  %313 = vst [vmem:[%s3187_s13 + $0x68] sm:$0xff] %v312_v13   ;;  %v320_v15 = vld [vmem:[%s3182_s11 + $0xb8] sm:$0xff]   ;;  %v324_v16 = vld [vmem:[%s3182_s11 + $0x100] sm:$0xff]  }
  0x34   : > { %317 = vst [vmem:[%s3187_s13 + $0x70] sm:$0xff] %v316_v14   ;;  %v328_v17 = vld [vmem:[%s3182_s11 + $0x108] sm:$0xff]   ;;  %321 = vst [vmem:[%s3187_s13 + $0x78] sm:$0xff] %v320_v15   ;;  %v332_v18 = vld [vmem:[%s3182_s11 + $0x110] sm:$0xff]  }
  0x35   : > { %325 = vst [vmem:[%s3187_s13 + $0x80] sm:$0xff] %v324_v16   ;;  %329 = vst [vmem:[%s3187_s13 + $0x88] sm:$0xff] %v328_v17   ;;  %v336_v19 = vld [vmem:[%s3182_s11 + $0x118] sm:$0xff]   ;;  %v340_v20 = vld [vmem:[%s3182_s11 + $0x120] sm:$0xff]  }
  0x36   : > { %333 = vst [vmem:[%s3187_s13 + $0x90] sm:$0xff] %v332_v18   ;;  %337 = vst [vmem:[%s3187_s13 + $0x98] sm:$0xff] %v336_v19   ;;  %v344_v21 = vld [vmem:[%s3182_s11 + $0x128] sm:$0xff]   ;;  %v348_v22 = vld [vmem:[%s3182_s11 + $0x130] sm:$0xff]  }
  0x37   : > { %341 = vst [vmem:[%s3187_s13 + $0xa0] sm:$0xff] %v340_v20   ;;  %v352_v23 = vld [vmem:[%s3182_s11 + $0x138] sm:$0xff]   ;;  %345 = vst [vmem:[%s3187_s13 + $0xa8] sm:$0xff] %v344_v21   ;;  %v356_v24 = vld [vmem:[%s3182_s11 + $0x180] sm:$0xff]  }
  0x38   : > { %349 = vst [vmem:[%s3187_s13 + $0xb0] sm:$0xff] %v348_v22   ;;  %353 = vst [vmem:[%s3187_s13 + $0xb8] sm:$0xff] %v352_v23   ;;  %v360_v25 = vld [vmem:[%s3182_s11 + $0x188] sm:$0xff]   ;;  %v364_v26 = vld [vmem:[%s3182_s11 + $0x190] sm:$0xff]  }
  0x39   : > { %357 = vst [vmem:[%s3187_s13 + $0xc0] sm:$0xff] %v356_v24   ;;  %361 = vst [vmem:[%s3187_s13 + $0xc8] sm:$0xff] %v360_v25   ;;  %v368_v27 = vld [vmem:[%s3182_s11 + $0x198] sm:$0xff]   ;;  %v372_v28 = vld [vmem:[%s3182_s11 + $0x1a0] sm:$0xff]  }
  0x3a   : > { %365 = vst [vmem:[%s3187_s13 + $0xd0] sm:$0xff] %v364_v26   ;;  %v376_v29 = vld [vmem:[%s3182_s11 + $0x1a8] sm:$0xff]   ;;  %369 = vst [vmem:[%s3187_s13 + $0xd8] sm:$0xff] %v368_v27   ;;  %v380_v30 = vld [vmem:[%s3182_s11 + $0x1b0] sm:$0xff]  }
  0x3b   : > { %373 = vst [vmem:[%s3187_s13 + $0xe0] sm:$0xff] %v372_v28   ;;  %377 = vst [vmem:[%s3187_s13 + $0xe8] sm:$0xff] %v376_v29   ;;  %v384_v31 = vld [vmem:[%s3182_s11 + $0x1b8] sm:$0xff]   ;;  %v388_v32 = vld [vmem:[%s3182_s11 + $0x200] sm:$0xff]  }
  0x3c   : > { %381 = vst [vmem:[%s3187_s13 + $0xf0] sm:$0xff] %v380_v30   ;;  %385 = vst [vmem:[%s3187_s13 + $0xf8] sm:$0xff] %v384_v31   ;;  %v392_v33 = vld [vmem:[%s3182_s11 + $0x208] sm:$0xff]   ;;  %v396_v34 = vld [vmem:[%s3182_s11 + $0x210] sm:$0xff]  }
  0x3d   : > { %389 = vst [vmem:[%s3187_s13 + $0x100] sm:$0xff] %v388_v32   ;;  %v400_v35 = vld [vmem:[%s3182_s11 + $0x218] sm:$0xff]   ;;  %393 = vst [vmem:[%s3187_s13 + $0x108] sm:$0xff] %v392_v33   ;;  %v404_v36 = vld [vmem:[%s3182_s11 + $0x220] sm:$0xff]  }
  0x3e   : > { %397 = vst [vmem:[%s3187_s13 + $0x110] sm:$0xff] %v396_v34   ;;  %401 = vst [vmem:[%s3187_s13 + $0x118] sm:$0xff] %v400_v35   ;;  %v408_v37 = vld [vmem:[%s3182_s11 + $0x228] sm:$0xff]   ;;  %v412_v38 = vld [vmem:[%s3182_s11 + $0x230] sm:$0xff]  }
  0x3f   : > { %405 = vst [vmem:[%s3187_s13 + $0x120] sm:$0xff] %v404_v36   ;;  %409 = vst [vmem:[%s3187_s13 + $0x128] sm:$0xff] %v408_v37   ;;  %v416_v39 = vld [vmem:[%s3182_s11 + $0x238] sm:$0xff]   ;;  %v420_v40 = vld [vmem:[%s3182_s11 + $0x280] sm:$0xff]  }
  0x40   : > { %413 = vst [vmem:[%s3187_s13 + $0x130] sm:$0xff] %v412_v38   ;;  %v424_v41 = vld [vmem:[%s3182_s11 + $0x288] sm:$0xff]   ;;  %417 = vst [vmem:[%s3187_s13 + $0x138] sm:$0xff] %v416_v39   ;;  %v428_v42 = vld [vmem:[%s3182_s11 + $0x290] sm:$0xff]  }
  0x41   : > { %421 = vst [vmem:[%s3187_s13 + $0x140] sm:$0xff] %v420_v40   ;;  %425 = vst [vmem:[%s3187_s13 + $0x148] sm:$0xff] %v424_v41   ;;  %v432_v43 = vld [vmem:[%s3182_s11 + $0x298] sm:$0xff]   ;;  %v436_v44 = vld [vmem:[%s3182_s11 + $0x2a0] sm:$0xff]  }
  0x42   : > { %429 = vst [vmem:[%s3187_s13 + $0x150] sm:$0xff] %v428_v42   ;;  %433 = vst [vmem:[%s3187_s13 + $0x158] sm:$0xff] %v432_v43   ;;  %v440_v45 = vld [vmem:[%s3182_s11 + $0x2a8] sm:$0xff]   ;;  %v444_v46 = vld [vmem:[%s3182_s11 + $0x2b0] sm:$0xff]  }
  0x43   : > { %437 = vst [vmem:[%s3187_s13 + $0x160] sm:$0xff] %v436_v44   ;;  %v448_v47 = vld [vmem:[%s3182_s11 + $0x2b8] sm:$0xff]   ;;  %441 = vst [vmem:[%s3187_s13 + $0x168] sm:$0xff] %v440_v45   ;;  %v452_v48 = vld [vmem:[%s3182_s11 + $0x300] sm:$0xff]  }
  0x44   : > { %445 = vst [vmem:[%s3187_s13 + $0x170] sm:$0xff] %v444_v46   ;;  %449 = vst [vmem:[%s3187_s13 + $0x178] sm:$0xff] %v448_v47   ;;  %v456_v49 = vld [vmem:[%s3182_s11 + $0x308] sm:$0xff]   ;;  %v460_v50 = vld [vmem:[%s3182_s11 + $0x310] sm:$0xff]  }
  0x45   : > { %453 = vst [vmem:[%s3187_s13 + $0x180] sm:$0xff] %v452_v48   ;;  %457 = vst [vmem:[%s3187_s13 + $0x188] sm:$0xff] %v456_v49   ;;  %v464_v51 = vld [vmem:[%s3182_s11 + $0x318] sm:$0xff]   ;;  %v468_v52 = vld [vmem:[%s3182_s11 + $0x320] sm:$0xff]  }
  0x46   : > { %461 = vst [vmem:[%s3187_s13 + $0x190] sm:$0xff] %v460_v50   ;;  %v472_v53 = vld [vmem:[%s3182_s11 + $0x328] sm:$0xff]   ;;  %465 = vst [vmem:[%s3187_s13 + $0x198] sm:$0xff] %v464_v51   ;;  %v476_v54 = vld [vmem:[%s3182_s11 + $0x330] sm:$0xff]  }
  0x47   : > { %469 = vst [vmem:[%s3187_s13 + $0x1a0] sm:$0xff] %v468_v52   ;;  %473 = vst [vmem:[%s3187_s13 + $0x1a8] sm:$0xff] %v472_v53   ;;  %v480_v55 = vld [vmem:[%s3182_s11 + $0x338] sm:$0xff]   ;;  %v484_v56 = vld [vmem:[%s3182_s11 + $0x380] sm:$0xff]  }
  0x48   : > { %477 = vst [vmem:[%s3187_s13 + $0x1b0] sm:$0xff] %v476_v54   ;;  %481 = vst [vmem:[%s3187_s13 + $0x1b8] sm:$0xff] %v480_v55   ;;  %v488_v57 = vld [vmem:[%s3182_s11 + $0x388] sm:$0xff]   ;;  %v492_v58 = vld [vmem:[%s3182_s11 + $0x390] sm:$0xff]  }
  0x49   : > { %485 = vst [vmem:[%s3187_s13 + $0x1c0] sm:$0xff] %v484_v56   ;;  %v496_v59 = vld [vmem:[%s3182_s11 + $0x398] sm:$0xff]   ;;  %489 = vst [vmem:[%s3187_s13 + $0x1c8] sm:$0xff] %v488_v57   ;;  %v500_v60 = vld [vmem:[%s3182_s11 + $0x3a0] sm:$0xff]  }
  0x4a   : > { %493 = vst [vmem:[%s3187_s13 + $0x1d0] sm:$0xff] %v492_v58   ;;  %497 = vst [vmem:[%s3187_s13 + $0x1d8] sm:$0xff] %v496_v59   ;;  %v504_v61 = vld [vmem:[%s3182_s11 + $0x3a8] sm:$0xff]   ;;  %v508_v62 = vld [vmem:[%s3182_s11 + $0x3b0] sm:$0xff]  }
  0x4b   : > { %501 = vst [vmem:[%s3187_s13 + $0x1e0] sm:$0xff] %v500_v60   ;;  %505 = vst [vmem:[%s3187_s13 + $0x1e8] sm:$0xff] %v504_v61   ;;  %v512_v63 = vld [vmem:[%s3182_s11 + $0x3b8] sm:$0xff]  }
  0x4c   : > { %509 = vst [vmem:[%s3187_s13 + $0x1f0] sm:$0xff] %v508_v62   ;;  %513 = vst [vmem:[%s3187_s13 + $0x1f8] sm:$0xff] %v512_v63  }
  0x4d PF: > { %p2433_p0 = scmp.ge.s32.totalorder %s3039_s30, 1  ;;  %p811_p1 = scmp.lt.s32.totalorder %s3039_s30, 5 }
  0x4f   : > { %p812_p2 = pnand %p2433_p0, %p811_p1 }
  0x51   : > { %815 = sbr.rel (%p812_p2) target bundleno = 1415 (0x587), region = 77 }
  0x58   : > { %s818_s9 = sand.u32 1, %s3015_s24   ;;  %s3318_s10 = sand.u32 1, %s3007_s22  }
  0x59   : > { %s2434_s7 = sshll.u32 %s818_s9, 9  ;;  %s2435_s8 = sshll.u32 %s3318_s10, 3 }
  0x5a   : > { %p866_p3 = scmp.lt.s32.totalorder %s3027_s27, 1  ;;  %p868_p4 = scmp.lt.s32.totalorder %s3023_s26, 1 }
  0x5b   : > { %s3335_s9 = scalar_lea.vmem [#allocation4], %s2434_s7  ;;  %s3337_s19 = scalar_lea.vmem [#allocation5], %s2435_s8 }
  0x5c   : > { %s867_s12 = scalar_select %p866_p3, %s3027_s27, 1 }
  0x5d   : > { %s869_s16 = scalar_select %p868_p4, %s3023_s26, 1 }
  0x5e   : > { %s2437_s17 = sshll.u32 %s867_s12, 1  ;;  %s2439_s14 = sshll.u32 %s867_s12, 3 }
  0x5f   : > { %s871_s11 = sadd.s32 %s2437_s17, %s869_s16  ;;  %s3328_s29 = scalar_lea.vmem %s4055_s2, %s2439_s14 }
  0x60   : > { %s2438_s28 = sshll.u32 %s871_s11, 3  ;;  %s3339_s23 = scalar_lea.vmem [#allocation7], %s2435_s8 }
  0x61   : > { %s3333_s25 = scalar_lea.vmem %s4054_s1, %s2438_s28  ;;  %p2440_p5 = scmp.ne.s32.totalorder %s3023_s26, 0 }
  0x62   : > { %vm882_vm0 = vcmask (!%p2440_p5), 261120   ;;  %vm884_vm1 = vcmask (!%p2440_p5), 7168   ;;  %v3041_v0 = vmov (!%p2440_p5), 0.0  }
  0x63   : > { %881 = sbr.rel (%p2440_p5) target bundleno = 106 (0x6a), region = 85  ;;  %883 = vst.msk [vmem:[#allocation2] sm:$0xff] (!%p2440_p5), %vm882_vm0, %v3041_v0 }
  0x64   : > { %885 = vst.msk [vmem:[#allocation3] sm:$0xff] (!%p2440_p5), %vm884_vm1, %v3041_v0 }
  0x6a PF: > { %v1144_v1 = vlaneseq  ;;  %v3345_v3 = vld [vmem:[%s3333_s25] sm:$0xff]  ;;  %v2452_v24 = vld [vmem:[%s3335_s9] sm:$0xff]   ;;  %v2707_v26 = vld [vmem:[%s3335_s9 + $0x8] sm:$0xff]   ;;  %vm1808_vm2 = vcmask 261120   ;;  %vm2113_vm3 = vcmask 1041409   ;;  %vm2115_vm4 = vcmask 1042434  }
  0x6b   : > { %v2454_v25 = vunpack.c.h.bf16 %v2452_v24  ;;  %v2453_v27 = vunpack.c.l.bf16 %v2452_v24  ;;  %v2457_v30 = vunpack.c.l.bf16 %v2707_v26  ;;  %v2458_v36 = vunpack.c.h.bf16 %v2707_v26  ;;  %v2714_v38 = vld [vmem:[%s3335_s9 + $0x40] sm:$0xff]   ;;  %v2708_v43 = vld [vmem:[%s3335_s9 + $0x10] sm:$0xff]   ;;  %v2715_v46 = vld [vmem:[%s3335_s9 + $0x48] sm:$0xff]   ;;  %p2441_p6 = scmp.ne.s32.totalorder %s3023_s26, 1 }
  0x6c   : > { %v3342_v2 = vshrl.u32 %v1144_v1, 7  ;;  %v2486_v44 = vunpack.c.h.bf16 %v2714_v38  ;;  %v2485_v45 = vunpack.c.l.bf16 %v2714_v38  ;;  %v2461_v49 = vunpack.c.l.bf16 %v2708_v43  ;;  %v2716_v57 = vld [vmem:[%s3335_s9 + $0x50] sm:$0xff]   ;;  %v2709_v63 = vld [vmem:[%s3335_s9 + $0x18] sm:$0xff]   ;;  %v2718_v38 = vld [vmem:[%s3335_s9 + $0x60] sm:$0xff]  }
  0x6d   : > { %v2489_v52 = vunpack.c.l.bf16 %v2715_v46  ;;  %v2490_v56 = vunpack.c.h.bf16 %v2715_v46  ;;  %v2462_v59 = vunpack.c.h.bf16 %v2708_v43  ;;  %vm2117_vm5 = vcmask 1043459  }
  0x6e   : > { %v1146_v4 = vsub.s32 0, %v3342_v2  ;;  %v1213_v6 = vsub.s32 1, %v3342_v2  ;;  %v1280_v8 = vsub.s32 2, %v3342_v2  ;;  %v1347_v10 = vsub.s32 3, %v3342_v2 }
  0x6f   : > { %v1414_v16 = vsub.s32 4, %v3342_v2  ;;  %vm2119_vm6 = vcmask 1044484   ;;  %vm2121_vm7 = vcmask 1045509   ;;  %vm2123_vm8 = vcmask 1046534  }
  0x70   : > { %v1147_v5 = vrot.slane %v3345_v3, %v1146_v4  ;;  %v1214_v7 = vrot.slane %v3345_v3, %v1213_v6  ;;  %v1281_v9 = vrot.slane %v3345_v3, %v1280_v8  ;;  %v1348_v11 = vrot.slane %v3345_v3, %v1347_v10 }
  0x71   : > { %v3359_v19 = vrot.slane %v3345_v3, %v1414_v16  ;;  %v2493_v4 = vunpack.c.l.bf16 %v2716_v57  ;;  %v2494_v8 = vunpack.c.h.bf16 %v2716_v57  ;;  %vm2125_vm9 = vcmask 1047559  }
  0x72   : > { %1157 = vbcast.lane.b32.xlu1 %v1147_v5, 272  ;;  %1149 = vbcast.lane.b32.xlu0 %v1147_v5, 256  ;;  %vm2134_vm10 = vcmask 7168   ;;  %vm3044_vm11 = vmmov (!%p2441_p6), 0  }
  0x76   : > { %1161 = vbcast.lane.b32.xlu1 %v1147_v5, 280  ;;  %1153 = vbcast.lane.b32.xlu0 %v1147_v5, 264 }
  0x7a   : > { %1169 = vbcast.lane.b32.xlu1 %v1147_v5, 296  ;;  %1165 = vbcast.lane.b32.xlu0 %v1147_v5, 288 }
  0x7e   : > { %1177 = vbcast.lane.b32.xlu1 %v1147_v5, 312  ;;  %1173 = vbcast.lane.b32.xlu0 %v1147_v5, 304 }
  0x82   : > { %1185 = vbcast.lane.b32.xlu1 %v1147_v5, 328  ;;  %1181 = vbcast.lane.b32.xlu0 %v1147_v5, 320 }
  0x86   : > { %1193 = vbcast.lane.b32.xlu1 %v1147_v5, 344  ;;  %1189 = vbcast.lane.b32.xlu0 %v1147_v5, 336 }
  0x8a   : > { %1201 = vbcast.lane.b32.xlu1 %v1147_v5, 360  ;;  %1197 = vbcast.lane.b32.xlu0 %v1147_v5, 352 }
  0x8e   : > { %1209 = vbcast.lane.b32.xlu1 %v1147_v5, 376  ;;  %1205 = vbcast.lane.b32.xlu0 %v1147_v5, 368 }
  0x92   : > { %1220 = vbcast.lane.b32.xlu1 %v1214_v7, 264  ;;  %1216 = vbcast.lane.b32.xlu0 %v1214_v7, 256 }
  0x96   : > { %1228 = vbcast.lane.b32.xlu1 %v1214_v7, 280  ;;  %1224 = vbcast.lane.b32.xlu0 %v1214_v7, 272 }
  0x9a   : > { %1236 = vbcast.lane.b32.xlu1 %v1214_v7, 296  ;;  %1232 = vbcast.lane.b32.xlu0 %v1214_v7, 288 }
  0x9e   : > { %1244 = vbcast.lane.b32.xlu1 %v1214_v7, 312  ;;  %1240 = vbcast.lane.b32.xlu0 %v1214_v7, 304 }
  0xa2   : > { %1252 = vbcast.lane.b32.xlu1 %v1214_v7, 328  ;;  %1248 = vbcast.lane.b32.xlu0 %v1214_v7, 320 }
  0xa6   : > { %1260 = vbcast.lane.b32.xlu1 %v1214_v7, 344  ;;  %1256 = vbcast.lane.b32.xlu0 %v1214_v7, 336 }
  0xaa   : > { %1268 = vbcast.lane.b32.xlu1 %v1214_v7, 360  ;;  %1264 = vbcast.lane.b32.xlu0 %v1214_v7, 352 }
  0xae   : > { %1276 = vbcast.lane.b32.xlu1 %v1214_v7, 376  ;;  %1272 = vbcast.lane.b32.xlu0 %v1214_v7, 368 }
  0xb2   : > { %1287 = vbcast.lane.b32.xlu1 %v1281_v9, 264  ;;  %1283 = vbcast.lane.b32.xlu0 %v1281_v9, 256 }
  0xb6   : > { %1295 = vbcast.lane.b32.xlu1 %v1281_v9, 280  ;;  %1291 = vbcast.lane.b32.xlu0 %v1281_v9, 272 }
  0xba   : > { %1303 = vbcast.lane.b32.xlu1 %v1281_v9, 296  ;;  %1299 = vbcast.lane.b32.xlu0 %v1281_v9, 288 }
  0xbe   : > { %1311 = vbcast.lane.b32.xlu1 %v1281_v9, 312  ;;  %1307 = vbcast.lane.b32.xlu0 %v1281_v9, 304 }
  0xc2   : > { %1319 = vbcast.lane.b32.xlu1 %v1281_v9, 328  ;;  %1315 = vbcast.lane.b32.xlu0 %v1281_v9, 320 }
  0xc6   : > { %1327 = vbcast.lane.b32.xlu1 %v1281_v9, 344  ;;  %1323 = vbcast.lane.b32.xlu0 %v1281_v9, 336 }
  0xca   : > { %1335 = vbcast.lane.b32.xlu1 %v1281_v9, 360  ;;  %1331 = vbcast.lane.b32.xlu0 %v1281_v9, 352 }
  0xce   : > { %1343 = vbcast.lane.b32.xlu1 %v1281_v9, 376  ;;  %1339 = vbcast.lane.b32.xlu0 %v1281_v9, 368  ;;  %v2717_v9 = vld [vmem:[%s3335_s9 + $0x58] sm:$0xff]  }
  0xd2   : > { %1354 = vbcast.lane.b32.xlu1 %v1348_v11, 264  ;;  %1350 = vbcast.lane.b32.xlu0 %v1348_v11, 256 }
  0xd6   : > { %1362 = vbcast.lane.b32.xlu1 %v1348_v11, 280  ;;  %1358 = vbcast.lane.b32.xlu0 %v1348_v11, 272 }
  0xda   : > { %1370 = vbcast.lane.b32.xlu1 %v1348_v11, 296  ;;  %1366 = vbcast.lane.b32.xlu0 %v1348_v11, 288 }
  0xde   : > { %1378 = vbcast.lane.b32.xlu1 %v1348_v11, 312  ;;  %1374 = vbcast.lane.b32.xlu0 %v1348_v11, 304 }
  0xe2   : > { %1386 = vbcast.lane.b32.xlu1 %v1348_v11, 328  ;;  %1382 = vbcast.lane.b32.xlu0 %v1348_v11, 320 }
  0xe4   : > { %v1158_v12 = vpop.permute.xlu1 %1157  ;;  %v1150_v13 = vpop.permute.xlu0 %1149 }
  0xe5   : > { %v1680_v32 = vmul.f32 %v2453_v27, %v1150_v13  ;;  %v1682_v35 = vmul.f32 %v2457_v30, %v1158_v12  ;;  %v1481_v12 = vsub.s32 5, %v3342_v2  ;;  %v2465_v13 = vunpack.c.l.bf16 %v2709_v63 }
  0xe6   : > { %1394 = vbcast.lane.b32.xlu1 %v1348_v11, 344  ;;  %1390 = vbcast.lane.b32.xlu0 %v1348_v11, 336 }
  0xe7   : > { %v1809_v39 = vsel %vm1808_vm2, %v1680_v32, 0.0  ;;  %v1812_v47 = vsel %vm1808_vm2, %v1682_v35, 0.0  ;;  %v2498_v32 = vunpack.c.h.bf16 %v2717_v9 }
  0xe8   : > { %v1162_v14 = vpop.permute.xlu1 %1161  ;;  %v1154_v15 = vpop.permute.xlu0 %1153 }
  0xe9   : > { %v1681_v31 = vmul.f32 %v2454_v25, %v1154_v15  ;;  %v1683_v48 = vmul.f32 %v2458_v36, %v1162_v14 }
  0xea   : > { %1402 = vbcast.lane.b32.xlu1 %v1348_v11, 360  ;;  %1398 = vbcast.lane.b32.xlu0 %v1348_v11, 352 }
  0xeb   : > { %v1810_v37 = vsel %vm1808_vm2, %v1681_v31, 0.0  ;;  %v1814_v58 = vsel %vm1808_vm2, %v1683_v48, 0.0 }
  0xec   : > { %v3356_v17 = vpop.permute.xlu1 %1169  ;;  %v1166_v18 = vpop.permute.xlu0 %1165  ;;  %v1811_v42 = vadd.f32 %v1810_v37, %v1809_v39  ;;  %v3418_v37 = vrot.slane %v3345_v3, %v1481_v12  ;;  %v1548_v39 = vsub.s32 6, %v3342_v2 }
  0xed   : > { %v1684_v62 = vmul.f32 %v2461_v49, %v1166_v18  ;;  %v1685_v10 = vmul.f32 %v2462_v59, %v3356_v17  ;;  %v2466_v18 = vunpack.c.h.bf16 %v2709_v63  ;;  %v2497_v17 = vunpack.c.l.bf16 %v2717_v9 }
  0xee   : > { %1410 = vbcast.lane.b32.xlu1 %v1348_v11, 376  ;;  %1406 = vbcast.lane.b32.xlu0 %v1348_v11, 368  ;;  %v1813_v53 = vadd.f32 %v1812_v47, %v1811_v42 }
  0xef   : > { %v1816_v16 = vsel %vm1808_vm2, %v1684_v62, 0.0  ;;  %v1818_v35 = vsel %vm1808_vm2, %v1685_v10, 0.0 }
  0xf0   : > { %v3361_v20 = vpop.permute.xlu1 %1177  ;;  %v3363_v21 = vpop.permute.xlu0 %1173  ;;  %v1815_v5 = vadd.f32 %v1814_v58, %v1813_v53 }
  0xf2   : > { %1421 = vbcast.lane.b32.xlu1 %v3359_v19, 264  ;;  %1417 = vbcast.lane.b32.xlu0 %v3359_v19, 256  ;;  %v1817_v27 = vadd.f32 %v1816_v16, %v1815_v5 }
  0xf4   : > { %v3367_v22 = vpop.permute.xlu1 %1185  ;;  %v3369_v23 = vpop.permute.xlu0 %1181  ;;  %v1819_v49 = vadd.f32 %v1818_v35, %v1817_v27  ;;  %v2720_v27 = vld [vmem:[%s3335_s9 + $0x70] sm:$0xff]  }
  0xf6   : > { %1429 = vbcast.lane.b32.xlu1 %v3359_v19, 280  ;;  %1425 = vbcast.lane.b32.xlu0 %v3359_v19, 272 }
  0xf8   : > { %v3375_v28 = vpop.permute.xlu1 %1193  ;;  %v3377_v29 = vpop.permute.xlu0 %1189 }
  0xfa   : > { %1437 = vbcast.lane.b32.xlu1 %v3359_v19, 296  ;;  %1433 = vbcast.lane.b32.xlu0 %v3359_v19, 288 }
  0xfc   : > { %v3381_v33 = vpop.permute.xlu1 %1201  ;;  %v3383_v34 = vpop.permute.xlu0 %1197 }
  0xfe   : > { %1445 = vbcast.lane.b32.xlu1 %v3359_v19, 312  ;;  %1441 = vbcast.lane.b32.xlu0 %v3359_v19, 304 }
 0x100   : > { %v3390_v40 = vpop.permute.xlu1 %1209  ;;  %v3392_v41 = vpop.permute.xlu0 %1205 }
 0x102   : > { %1453 = vbcast.lane.b32.xlu1 %v3359_v19, 328  ;;  %1449 = vbcast.lane.b32.xlu0 %v3359_v19, 320 }
 0x104   : > { %v1221_v50 = vpop.permute.xlu1 %1220  ;;  %v1217_v51 = vpop.permute.xlu0 %1216 }
 0x105   : > { %v1697_v54 = vmul.f32 %v2486_v44, %v1221_v50  ;;  %v1696_v55 = vmul.f32 %v2485_v45, %v1217_v51  ;;  %v1686_v44 = vmul.f32 %v2465_v13, %v3363_v21  ;;  %v2710_v45 = vld [vmem:[%s3335_s9 + $0x20] sm:$0xff]   ;;  %v1615_v21 = vsub.s32 7, %v3342_v2 }
 0x106   : > { %1461 = vbcast.lane.b32.xlu1 %v3359_v19, 344  ;;  %1457 = vbcast.lane.b32.xlu0 %v3359_v19, 336 }
 0x107   : > { %v1847_v60 = vsel %vm1808_vm2, %v1697_v54, 0.0  ;;  %v1846_v61 = vsel %vm1808_vm2, %v1696_v55, 0.0  ;;  %v3430_v54 = vrot.slane %v3345_v3, %v1548_v39  ;;  %v2469_v55 = vunpack.c.l.bf16 %v2710_v45 }
 0x108   : > { %v1229_v0 = vpop.permute.xlu1 %1228  ;;  %v1225_v1 = vpop.permute.xlu0 %1224  ;;  %v1848_v11 = vadd.f32 %v1847_v60, %v1846_v61  ;;  %v1820_v57 = vsel %vm1808_vm2, %v1686_v44, 0.0  ;;  %v2502_v60 = vunpack.c.h.bf16 %v2718_v38  ;;  %v3441_v2 = vrot.slane %v3345_v3, %v1615_v21 }
 0x109   : > { %v1699_v6 = vmul.f32 %v2490_v56, %v1229_v0  ;;  %v1698_v7 = vmul.f32 %v2489_v52, %v1225_v1  ;;  %v1687_v52 = vmul.f32 %v2466_v18, %v3361_v20  ;;  %v1821_v62 = vadd.f32 %v1820_v57, %v1819_v49  ;;  %v2719_v0 = vld [vmem:[%s3335_s9 + $0x68] sm:$0xff]  }
 0x10a   : > { %1469 = vbcast.lane.b32.xlu1 %v3359_v19, 360  ;;  %1465 = vbcast.lane.b32.xlu0 %v3359_v19, 352  ;;  %v2505_v12 = vunpack.c.l.bf16 %v2719_v0  ;;  %v2506_v18 = vunpack.c.h.bf16 %v2719_v0  ;;  %v2713_v0 = vld [vmem:[%s3335_s9 + $0x38] sm:$0xff]  }
 0x10b   : > { %v1851_v14 = vsel %vm1808_vm2, %v1699_v6, 0.0  ;;  %v1849_v15 = vsel %vm1808_vm2, %v1698_v7, 0.0  ;;  %v1822_v1 = vsel %vm1808_vm2, %v1687_v52, 0.0  ;;  %v1688_v6 = vmul.f32 %v2469_v55, %v3369_v23  ;;  %v2711_v7 = vld [vmem:[%s3335_s9 + $0x28] sm:$0xff]  }
 0x10c   : > { %v1850_v24 = vadd.f32 %v1849_v15, %v1848_v11  ;;  %v1237_v25 = vpop.permute.xlu1 %1236  ;;  %v1233_v26 = vpop.permute.xlu0 %1232  ;;  %v1823_v13 = vadd.f32 %v1822_v1, %v1821_v62  ;;  %v2473_v3 = vunpack.c.l.bf16 %v2711_v7 }
 0x10d   : > { %v1701_v30 = vmul.f32 %v2494_v8, %v1237_v25  ;;  %v1700_v31 = vmul.f32 %v2493_v4, %v1233_v26  ;;  %v2470_v4 = vunpack.c.h.bf16 %v2710_v45  ;;  %v1824_v23 = vsel %vm1808_vm2, %v1688_v6, 0.0 }
 0x10e   : > { %v1852_v36 = vadd.f32 %v1851_v14, %v1850_v24  ;;  %1477 = vbcast.lane.b32.xlu1 %v3359_v19, 376  ;;  %1473 = vbcast.lane.b32.xlu0 %v3359_v19, 368  ;;  %v2501_v19 = vunpack.c.l.bf16 %v2718_v38  ;;  %v1690_v35 = vmul.f32 %v2473_v3, %v3377_v29 }
 0x10f   : > { %v1855_v42 = vsel %vm1808_vm2, %v1701_v30, 0.0  ;;  %v1853_v43 = vsel %vm1808_vm2, %v1700_v31, 0.0  ;;  %v1689_v14 = vmul.f32 %v2470_v4, %v3367_v22  ;;  %v2474_v30 = vunpack.c.h.bf16 %v2711_v7  ;;  %v2722_v31 = vld [vmem:[%s3335_s9 + $0x80] sm:$0xff]  }
 0x110   : > { %v1854_v46 = vadd.f32 %v1853_v43, %v1852_v36  ;;  %v1245_v47 = vpop.permute.xlu1 %1244  ;;  %v1241_v48 = vpop.permute.xlu0 %1240  ;;  %v2712_v36 = vld [vmem:[%s3335_s9 + $0x30] sm:$0xff]   ;;  %v1828_v52 = vsel %vm1808_vm2, %v1690_v35, 0.0  ;;  %v2726_v35 = vld [vmem:[%s3335_s9 + $0xa0] sm:$0xff]  }
 0x111   : > { %v1703_v50 = vmul.f32 %v2498_v32, %v1245_v47  ;;  %v1702_v51 = vmul.f32 %v2497_v17, %v1241_v48  ;;  %v1825_v17 = vadd.f32 %v1824_v23, %v1823_v13  ;;  %v1826_v22 = vsel %vm1808_vm2, %v1689_v14, 0.0  ;;  %v2723_v48 = vld [vmem:[%s3335_s9 + $0x88] sm:$0xff]   ;;  %v2725_v13 = vld [vmem:[%s3335_s9 + $0x98] sm:$0xff]  }
 0x112   : > { %v1856_v53 = vadd.f32 %v1855_v42, %v1854_v46  ;;  %1488 = vbcast.lane.b32.xlu1 %v3418_v37, 264  ;;  %1484 = vbcast.lane.b32.xlu0 %v3418_v37, 256  ;;  %v2509_v42 = vunpack.c.l.bf16 %v2720_v27  ;;  %v2518_v46 = vunpack.c.h.bf16 %v2722_v31  ;;  %v2517_v47 = vunpack.c.l.bf16 %v2722_v31 }
 0x113   : > { %v1857_v56 = vsel %vm1808_vm2, %v1702_v51, 0.0  ;;  %v1859_v58 = vsel %vm1808_vm2, %v1703_v50, 0.0  ;;  %v1827_v45 = vadd.f32 %v1826_v22, %v1825_v17  ;;  %v1691_v49 = vmul.f32 %v2474_v30, %v3375_v28 }
 0x114   : > { %v1858_v20 = vadd.f32 %v1857_v56, %v1856_v53  ;;  %v1253_v59 = vpop.permute.xlu1 %1252  ;;  %v1249_v61 = vpop.permute.xlu0 %1248  ;;  %v2477_v29 = vunpack.c.l.bf16 %v2712_v36  ;;  %v2510_v51 = vunpack.c.h.bf16 %v2720_v27  ;;  %v2521_v57 = vunpack.c.l.bf16 %v2723_v48 }
 0x115   : > { %v1704_v63 = vmul.f32 %v2501_v19, %v1249_v61  ;;  %v1705_v8 = vmul.f32 %v2502_v60, %v1253_v59  ;;  %v3466_v19 = vld [vmem:[%s3335_s9 + $0x78] sm:$0xff]   ;;  %v1829_v28 = vadd.f32 %v1828_v52, %v1827_v45  ;;  %v2522_v60 = vunpack.c.h.bf16 %v2723_v48 }
 0x116   : > { %1551 = vbcast.lane.b32.xlu1 %v3430_v54, 256  ;;  %1492 = vbcast.lane.b32.xlu0 %v3418_v37, 272  ;;  %v1860_v5 = vadd.f32 %v1859_v58, %v1858_v20  ;;  %v2724_v58 = vld [vmem:[%s3335_s9 + $0x90] sm:$0xff]   ;;  %v1830_v61 = vsel %vm1808_vm2, %v1691_v49, 0.0  ;;  %v2478_v62 = vunpack.c.h.bf16 %v2712_v36  ;;  %v1692_v7 = vmul.f32 %v2477_v29, %v3383_v34 }
 0x117   : > { %v1861_v9 = vsel %vm1808_vm2, %v1704_v63, 0.0  ;;  %v1863_v16 = vsel %vm1808_vm2, %v1705_v8, 0.0  ;;  %v2513_v63 = vunpack.c.l.bf16 %v3466_v19  ;;  %v2525_v6 = vunpack.c.l.bf16 %v2724_v58 }
 0x118   : > { %v1261_v10 = vpop.permute.xlu1 %1260  ;;  %v1257_v11 = vpop.permute.xlu0 %1256  ;;  %v1862_v15 = vadd.f32 %v1861_v9, %v1860_v5  ;;  %v1831_v14 = vadd.f32 %v1830_v61, %v1829_v28  ;;  %v2526_v23 = vunpack.c.h.bf16 %v2724_v58  ;;  %v2529_v17 = vunpack.c.l.bf16 %v2725_v13  ;;  %v2727_v28 = vld [vmem:[%s3335_s9 + $0xa8] sm:$0xff]  }
 0x119   : > { %v1706_v24 = vmul.f32 %v2505_v12, %v1257_v11  ;;  %v1707_v38 = vmul.f32 %v2506_v18, %v1261_v10  ;;  %v2481_v18 = vunpack.c.l.bf16 %v2713_v0  ;;  %v1832_v27 = vsel %vm1808_vm2, %v1692_v7, 0.0 }
 0x11a   : > { %1618 = vbcast.lane.b32.xlu1 %v3441_v2, 256  ;;  %1555 = vbcast.lane.b32.xlu0 %v3430_v54, 264  ;;  %v1864_v32 = vadd.f32 %v1863_v16, %v1862_v15  ;;  %v1693_v16 = vmul.f32 %v2478_v62, %v3381_v33  ;;  %v1833_v36 = vadd.f32 %v1832_v27, %v1831_v14  ;;  %v2533_v29 = vunpack.c.l.bf16 %v2726_v35 }
 0x11b   : > { %v1865_v39 = vsel %vm1808_vm2, %v1706_v24, 0.0  ;;  %v1867_v53 = vsel %vm1808_vm2, %v1707_v38, 0.0  ;;  %v2514_v24 = vunpack.c.h.bf16 %v3466_v19  ;;  %v2534_v58 = vunpack.c.h.bf16 %v2726_v35 }
 0x11c   : > { %v1269_v25 = vpop.permute.xlu1 %1268  ;;  %v1265_v26 = vpop.permute.xlu0 %1264  ;;  %v1866_v50 = vadd.f32 %v1865_v39, %v1864_v32  ;;  %v1834_v45 = vsel %vm1808_vm2, %v1693_v16, 0.0  ;;  %v2538_v7 = vunpack.c.h.bf16 %v2727_v28 }
 0x11d   : > { %v1708_v21 = vmul.f32 %v2509_v42, %v1265_v26  ;;  %v1709_v8 = vmul.f32 %v2510_v51, %v1269_v25  ;;  %v2530_v42 = vunpack.c.h.bf16 %v2725_v13 }
 0x11e   : > { %1559 = vbcast.lane.b32.xlu1 %v3430_v54, 272  ;;  %1622 = vbcast.lane.b32.xlu0 %v3441_v2, 264  ;;  %v1868_v1 = vadd.f32 %v1867_v53, %v1866_v50  ;;  %v1694_v50 = vmul.f32 %v2481_v18, %v3392_v41 }
 0x11f   : > { %v1869_v9 = vsel %vm1808_vm2, %v1708_v21, 0.0  ;;  %v1871_v22 = vsel %vm1808_vm2, %v1709_v8, 0.0  ;;  %v2728_v8 = vld [vmem:[%s3335_s9 + $0xb0] sm:$0xff]  }
 0x120   : > { %v3459_v43 = vpop.permute.xlu1 %1276  ;;  %v1273_v44 = vpop.permute.xlu0 %1272  ;;  %v1870_v34 = vadd.f32 %v1869_v9, %v1868_v1  ;;  %v1836_v61 = vsel %vm1808_vm2, %v1694_v50, 0.0 }
 0x121   : > { %v1710_v30 = vmul.f32 %v2513_v63, %v1273_v44  ;;  %v1711_v51 = vmul.f32 %v2514_v24, %v3459_v43 }
 0x122   : > { %1626 = vbcast.lane.b32.xlu1 %v3441_v2, 272  ;;  %1496 = vbcast.lane.b32.xlu0 %v3418_v37, 280  ;;  %v1872_v48 = vadd.f32 %v1871_v22, %v1870_v34  ;;  %v2542_v34 = vunpack.c.h.bf16 %v2728_v8 }
 0x123   : > { %v1873_v19 = vsel %vm1808_vm2, %v1710_v30, 0.0  ;;  %v1875_v62 = vsel %vm1808_vm2, %v1711_v51, 0.0 }
 0x124   : > { %v1288_v55 = vpop.permute.xlu1 %1287  ;;  %v1284_v56 = vpop.permute.xlu0 %1283  ;;  %v1874_v41 = vadd.f32 %v1873_v19, %v1872_v48 }
 0x125   : > { %v1713_v20 = vmul.f32 %v2518_v46, %v1288_v55  ;;  %v1712_v59 = vmul.f32 %v2517_v47, %v1284_v56  ;;  %v2482_v46 = vunpack.c.h.bf16 %v2713_v0  ;;  %v1835_v55 = vadd.f32 %v1834_v45, %v1833_v36 }
 0x126   : > { %1500 = vbcast.lane.b32.xlu1 %v3418_v37, 288  ;;  %1563 = vbcast.lane.b32.xlu0 %v3430_v54, 280 }
 0x127   : > { %v1884_v4 = vsel %vm1808_vm2, %v1713_v20, 0.0  ;;  %v1883_v5 = vsel %vm1808_vm2, %v1712_v59, 0.0  ;;  %v1695_v20 = vmul.f32 %v2482_v46, %v3390_v40  ;;  %v1837_v40 = vadd.f32 %v1836_v61, %v1835_v55 }
 0x128   : > { %v1885_v10 = vadd.f32 %v1884_v4, %v1883_v5  ;;  %v1296_v11 = vpop.permute.xlu1 %1295  ;;  %v1292_v12 = vpop.permute.xlu0 %1291  ;;  %v2537_v4 = vunpack.c.l.bf16 %v2727_v28 }
 0x129   : > { %v1715_v3 = vmul.f32 %v2522_v60, %v1296_v11  ;;  %v1714_v15 = vmul.f32 %v2521_v57, %v1292_v12  ;;  %v1838_v9 = vsel %vm1808_vm2, %v1695_v20, 0.0  ;;  %v1876_v11 = vadd.f32 %v1875_v62, %v1874_v41 }
 0x12a   : > { %1567 = vbcast.lane.b32.xlu1 %v3430_v54, 288  ;;  %1630 = vbcast.lane.b32.xlu0 %v3441_v2, 280  ;;  %v1839_v16 = vadd.f32 %v1838_v9, %v1837_v40 }
 0x12b   : > { %v1888_v25 = vsel %vm1808_vm2, %v1715_v3, 0.0  ;;  %v1886_v26 = vsel %vm1808_vm2, %v1714_v15, 0.0 }
 0x12c   : > { %v1887_v31 = vadd.f32 %v1886_v26, %v1885_v10  ;;  %v1304_v33 = vpop.permute.xlu1 %1303  ;;  %v1300_v32 = vpop.permute.xlu0 %1299  ;;  %v1840_v35 = vrot.slane %v1839_v16, 4 }
 0x12d   : > { %v1717_v38 = vmul.f32 %v2526_v23, %v1304_v33  ;;  %v1716_v39 = vmul.f32 %v2525_v6, %v1300_v32  ;;  %v2541_v23 = vunpack.c.l.bf16 %v2728_v8 }
 0x12e   : > { %v1889_v47 = vadd.f32 %v1888_v25, %v1887_v31  ;;  %1634 = vbcast.lane.b32.xlu1 %v3441_v2, 288  ;;  %1504 = vbcast.lane.b32.xlu0 %v3418_v37, 296  ;;  %v2729_v25 = vld [vmem:[%s3335_s9 + $0xb8] sm:$0xff]   ;;  %v1841_v51 = vadd.f32 %v1840_v35, %v1839_v16 }
 0x12f   : > { %v1892_v44 = vsel %vm1808_vm2, %v1717_v38, 0.0  ;;  %v1890_v49 = vsel %vm1808_vm2, %v1716_v39, 0.0  ;;  %v2545_v32 = vunpack.c.l.bf16 %v2729_v25  ;;  %v2546_v39 = vunpack.c.h.bf16 %v2729_v25 }
 0x130   : > { %v1891_v52 = vadd.f32 %v1890_v49, %v1889_v47  ;;  %v1312_v53 = vpop.permute.xlu1 %1311  ;;  %v1308_v21 = vpop.permute.xlu0 %1307 }
 0x131   : > { %v1719_v56 = vmul.f32 %v2530_v42, %v1312_v53  ;;  %v1718_v57 = vmul.f32 %v2529_v17, %v1308_v21  ;;  %v1877_v17 = vrot.slane %v1876_v11, 4  ;;  %v2730_v42 = vld [vmem:[%s3335_s9 + $0xc0] sm:$0xff]   ;;  %v2731_v21 = vld [vmem:[%s3335_s9 + $0xc8] sm:$0xff]  }
 0x132   : > { %v1893_v59 = vadd.f32 %v1892_v44, %v1891_v52  ;;  %1508 = vbcast.lane.b32.xlu1 %v3418_v37, 304  ;;  %1571 = vbcast.lane.b32.xlu0 %v3430_v54, 296  ;;  %v2550_v50 = vunpack.c.h.bf16 %v2730_v42  ;;  %v2549_v53 = vunpack.c.l.bf16 %v2730_v42  ;;  %v2553_v41 = vunpack.c.l.bf16 %v2731_v21 }
 0x133   : > { %v1896_v43 = vsel %vm1808_vm2, %v1719_v56, 0.0  ;;  %v1894_v60 = vsel %vm1808_vm2, %v1718_v57, 0.0  ;;  %v1878_v46 = vadd.f32 %v1877_v17, %v1876_v11  ;;  %v2554_v62 = vunpack.c.h.bf16 %v2731_v21 }
 0x134   : > { %v1895_v63 = vadd.f32 %v1894_v60, %v1893_v59  ;;  %v1320_v0 = vpop.permute.xlu1 %1319  ;;  %v1316_v1 = vpop.permute.xlu0 %1315 }
 0x135   : > { %v1721_v5 = vmul.f32 %v2534_v58, %v1320_v0  ;;  %v1720_v6 = vmul.f32 %v2533_v29, %v1316_v1  ;;  %v1879_v56 = vrot.slane %v1878_v46, 2 }
 0x136   : > { %v1897_v10 = vadd.f32 %v1896_v43, %v1895_v63  ;;  %1575 = vbcast.lane.b32.xlu1 %v3430_v54, 304  ;;  %1638 = vbcast.lane.b32.xlu0 %v3441_v2, 296  ;;  %v1842_v43 = vrot.slane %v1841_v51, 2  ;;  %v2732_v63 = vld [vmem:[%s3335_s9 + $0xd0] sm:$0xff]  }
 0x137   : > { %v1900_v12 = vsel %vm1808_vm2, %v1721_v5, 0.0  ;;  %v1898_v13 = vsel %vm1808_vm2, %v1720_v6, 0.0  ;;  %v1880_v1 = vadd.f32 %v1879_v56, %v1878_v46  ;;  %v2557_v9 = vunpack.c.l.bf16 %v2732_v63 }
 0x138   : > { %v1899_v14 = vadd.f32 %v1898_v13, %v1897_v10  ;;  %v1328_v3 = vpop.permute.xlu1 %1327  ;;  %v1324_v15 = vpop.permute.xlu0 %1323  ;;  %v1843_v10 = vadd.f32 %v1842_v43, %v1841_v51  ;;  %v2558_v13 = vunpack.c.h.bf16 %v2732_v63 }
 0x139   : > { %v1723_v18 = vmul.f32 %v2538_v7, %v1328_v3  ;;  %v1722_v24 = vmul.f32 %v2537_v4, %v1324_v15  ;;  %v1881_v15 = vrot.slane %v1880_v1, 1 }
 0x13a   : > { %v1901_v26 = vadd.f32 %v1900_v12, %v1899_v14  ;;  %1642 = vbcast.lane.b32.xlu1 %v3441_v2, 304  ;;  %1512 = vbcast.lane.b32.xlu0 %v3418_v37, 312  ;;  %v2733_v14 = vld [vmem:[%s3335_s9 + $0xd8] sm:$0xff]   ;;  %v1844_v17 = vrot.slane %v1843_v10, 1 }
 0x13b   : > { %v1904_v27 = vsel %vm1808_vm2, %v1723_v18, 0.0  ;;  %v1902_v22 = vsel %vm1808_vm2, %v1722_v24, 0.0  ;;  %v1882_v35 = vadd.f32 %v1881_v15, %v1880_v1 }
 0x13c   : > { %v1903_v30 = vadd.f32 %v1902_v22, %v1901_v26  ;;  %v1336_v31 = vpop.permute.xlu1 %1335  ;;  %v1332_v33 = vpop.permute.xlu0 %1331  ;;  %v2561_v26 = vunpack.c.l.bf16 %v2733_v14 }
 0x13d   : > { %v1725_v36 = vmul.f32 %v2542_v34, %v1336_v31  ;;  %v1724_v38 = vmul.f32 %v2541_v23, %v1332_v33  ;;  %v2734_v31 = vld [vmem:[%s3335_s9 + $0xe0] sm:$0xff]  }
 0x13e   : > { %v1905_v45 = vadd.f32 %v1904_v27, %v1903_v30  ;;  %1516 = vbcast.lane.b32.xlu1 %v3418_v37, 320  ;;  %1579 = vbcast.lane.b32.xlu0 %v3430_v54, 312  ;;  %v2562_v30 = vunpack.c.h.bf16 %v2733_v14 }
 0x13f   : > { %v1908_v47 = vsel %vm1808_vm2, %v1725_v36, 0.0  ;;  %v1906_v48 = vsel %vm1808_vm2, %v1724_v38, 0.0 }
 0x140   : > { %v1907_v44 = vadd.f32 %v1906_v48, %v1905_v45  ;;  %v1344_v49 = vpop.permute.xlu1 %1343  ;;  %v1340_v29 = vpop.permute.xlu0 %1339  ;;  %v1845_v48 = vadd.f32 %v1844_v17, %v1843_v10 }
 0x141   : > { %v1727_v19 = vmul.f32 %v2546_v39, %v1344_v49  ;;  %v1726_v52 = vmul.f32 %v2545_v32, %v1340_v29  ;;  %v2566_v29 = vunpack.c.h.bf16 %v2734_v31 }
 0x142   : > { %v1909_v55 = vadd.f32 %v1908_v47, %v1907_v44  ;;  %1583 = vbcast.lane.b32.xlu1 %v3430_v54, 320  ;;  %1646 = vbcast.lane.b32.xlu0 %v3441_v2, 312  ;;  %v2565_v47 = vunpack.c.l.bf16 %v2734_v31 }
 0x143   : > { %v1912_v57 = vsel %vm1808_vm2, %v1727_v19, 0.0  ;;  %v1910_v58 = vsel %vm1808_vm2, %v1726_v52, 0.0  ;;  %v2735_v19 = vld [vmem:[%s3335_s9 + $0xe8] sm:$0xff]   ;;  %v2114_v52 = vsel %vm2113_vm3, %v1882_v35, %v1845_v48 }
 0x144   : > { %v1911_v28 = vadd.f32 %v1910_v58, %v1909_v55  ;;  %v1355_v20 = vpop.permute.xlu1 %1354  ;;  %v1351_v59 = vpop.permute.xlu0 %1350 }
 0x145   : > { %v1729_v60 = vmul.f32 %v2550_v50, %v1355_v20  ;;  %v1728_v61 = vmul.f32 %v2549_v53, %v1351_v59  ;;  %v2570_v59 = vunpack.c.h.bf16 %v2735_v19 }
 0x146   : > { %v1913_v0 = vadd.f32 %v1912_v57, %v1911_v28  ;;  %1650 = vbcast.lane.b32.xlu1 %v3441_v2, 320  ;;  %1520 = vbcast.lane.b32.xlu0 %v3418_v37, 328 }
 0x147   : > { %v1921_v4 = vsel %vm1808_vm2, %v1729_v60, 0.0  ;;  %v1920_v40 = vsel %vm1808_vm2, %v1728_v61, 0.0  ;;  %v2736_v60 = vld [vmem:[%s3335_s9 + $0xf0] sm:$0xff]  }
 0x148   : > { %v1914_v5 = vrot.slane %v1913_v0, 4  ;;  %v1922_v6 = vadd.f32 %v1921_v4, %v1920_v40  ;;  %v1363_v7 = vpop.permute.xlu1 %1362  ;;  %v1359_v8 = vpop.permute.xlu0 %1358 }
 0x149   : > { %v1731_v11 = vmul.f32 %v2554_v62, %v1363_v7  ;;  %v1730_v12 = vmul.f32 %v2553_v41, %v1359_v8  ;;  %v2569_v41 = vunpack.c.l.bf16 %v2735_v19  ;;  %v2737_v8 = vld [vmem:[%s3335_s9 + $0xf8] sm:$0xff]  }
 0x14a   : > { %v1915_v3 = vadd.f32 %v1914_v5, %v1913_v0  ;;  %1524 = vbcast.lane.b32.xlu1 %v3418_v37, 336  ;;  %1587 = vbcast.lane.b32.xlu0 %v3430_v54, 328  ;;  %v2574_v5 = vunpack.c.h.bf16 %v2736_v60  ;;  %v2578_v15 = vunpack.c.h.bf16 %v2737_v8 }
 0x14b   : > { %v1925_v23 = vsel %vm1808_vm2, %v1731_v11, 0.0  ;;  %v1923_v16 = vsel %vm1808_vm2, %v1730_v12, 0.0 }
 0x14c   : > { %v1916_v18 = vrot.slane %v1915_v3, 2  ;;  %v1924_v24 = vadd.f32 %v1923_v16, %v1922_v6  ;;  %v1371_v34 = vpop.permute.xlu1 %1370  ;;  %v1367_v25 = vpop.permute.xlu0 %1366  ;;  %v2573_v6 = vunpack.c.l.bf16 %v2736_v60 }
 0x14d   : > { %v1733_v27 = vmul.f32 %v2558_v13, %v1371_v34  ;;  %v1732_v22 = vmul.f32 %v2557_v9, %v1367_v25 }
 0x14e   : > { %v1917_v33 = vadd.f32 %v1916_v18, %v1915_v3  ;;  %v1926_v32 = vadd.f32 %v1925_v23, %v1924_v24  ;;  %1591 = vbcast.lane.b32.xlu1 %v3430_v54, 336  ;;  %1654 = vbcast.lane.b32.xlu0 %v3441_v2, 328  ;;  %v2577_v23 = vunpack.c.l.bf16 %v2737_v8  ;;  %v2738_v18 = vld [vmem:[%s3335_s9 + $0x100] sm:$0xff]  }
 0x14f   : > { %v1929_v36 = vsel %vm1808_vm2, %v1733_v27, 0.0  ;;  %v1927_v38 = vsel %vm1808_vm2, %v1732_v22, 0.0  ;;  %v2581_v31 = vunpack.c.l.bf16 %v2738_v18 }
 0x150   : > { %v1918_v39 = vrot.slane %v1917_v33, 1  ;;  %v1928_v42 = vadd.f32 %v1927_v38, %v1926_v32  ;;  %v1379_v45 = vpop.permute.xlu1 %1378  ;;  %v1375_v46 = vpop.permute.xlu0 %1374  ;;  %v2739_v32 = vld [vmem:[%s3335_s9 + $0x108] sm:$0xff]  }
 0x151   : > { %v1735_v44 = vmul.f32 %v2562_v30, %v1379_v45  ;;  %v1734_v49 = vmul.f32 %v2561_v26, %v1375_v46  ;;  %v2582_v30 = vunpack.c.h.bf16 %v2738_v18  ;;  %v2585_v48 = vunpack.c.l.bf16 %v2739_v32 }
 0x152   : > { %v1919_v50 = vadd.f32 %v1918_v39, %v1917_v33  ;;  %v1930_v51 = vadd.f32 %v1929_v36, %v1928_v42  ;;  %1658 = vbcast.lane.b32.xlu1 %v3441_v2, 336  ;;  %1528 = vbcast.lane.b32.xlu0 %v3418_v37, 344 }
 0x153   : > { %v1933_v53 = vsel %vm1808_vm2, %v1735_v44, 0.0  ;;  %v1931_v21 = vsel %vm1808_vm2, %v1734_v49, 0.0  ;;  %v2740_v49 = vld [vmem:[%s3335_s9 + $0x110] sm:$0xff]  }
 0x154   : > { %v3549_v55 = vsel %vm2115_vm4, %v1919_v50, %v2114_v52  ;;  %v1932_v56 = vadd.f32 %v1931_v21, %v1930_v51  ;;  %v1387_v57 = vpop.permute.xlu1 %1386  ;;  %v1383_v58 = vpop.permute.xlu0 %1382 }
 0x155   : > { %v1737_v28 = vmul.f32 %v2566_v29, %v1387_v57  ;;  %v1736_v20 = vmul.f32 %v2565_v47, %v1383_v58  ;;  %v2586_v47 = vunpack.c.h.bf16 %v2739_v32  ;;  %v2590_v57 = vunpack.c.h.bf16 %v2740_v49 }
 0x156   : > { %v1934_v43 = vadd.f32 %v1933_v53, %v1932_v56  ;;  %1532 = vbcast.lane.b32.xlu1 %v3418_v37, 352  ;;  %1595 = vbcast.lane.b32.xlu0 %v3430_v54, 344  ;;  %v2589_v58 = vunpack.c.l.bf16 %v2740_v49 }
 0x157   : > { %v1937_v61 = vsel %vm1808_vm2, %v1737_v28, 0.0  ;;  %v1935_v62 = vsel %vm1808_vm2, %v1736_v20, 0.0  ;;  %v2741_v20 = vld [vmem:[%s3335_s9 + $0x118] sm:$0xff]  }
 0x158   : > { %v1936_v63 = vadd.f32 %v1935_v62, %v1934_v43  ;;  %v1395_v0 = vpop.permute.xlu1 %1394  ;;  %v1391_v1 = vpop.permute.xlu0 %1390 }
 0x159   : > { %v1739_v4 = vmul.f32 %v2570_v59, %v1395_v0  ;;  %v1738_v40 = vmul.f32 %v2569_v41, %v1391_v1  ;;  %v2594_v1 = vunpack.c.h.bf16 %v2741_v20 }
 0x15a   : > { %v1938_v7 = vadd.f32 %v1937_v61, %v1936_v63  ;;  %1599 = vbcast.lane.b32.xlu1 %v3430_v54, 352  ;;  %1662 = vbcast.lane.b32.xlu0 %v3441_v2, 344 }
 0x15b   : > { %v1941_v9 = vsel %vm1808_vm2, %v1739_v4, 0.0  ;;  %v1939_v10 = vsel %vm1808_vm2, %v1738_v40, 0.0  ;;  %v2593_v4 = vunpack.c.l.bf16 %v2741_v20 }
 0x15c   : > { %v1940_v11 = vadd.f32 %v1939_v10, %v1938_v7  ;;  %v1403_v12 = vpop.permute.xlu1 %1402  ;;  %v1399_v13 = vpop.permute.xlu0 %1398 }
 0x15d   : > { %v1741_v14 = vmul.f32 %v2574_v5, %v1403_v12  ;;  %v1740_v3 = vmul.f32 %v2573_v6, %v1399_v13 }
 0x15e   : > { %v1942_v16 = vadd.f32 %v1941_v9, %v1940_v11  ;;  %1666 = vbcast.lane.b32.xlu1 %v3441_v2, 352  ;;  %1536 = vbcast.lane.b32.xlu0 %v3418_v37, 360 }
 0x15f   : > { %v1945_v24 = vsel %vm1808_vm2, %v1741_v14, 0.0  ;;  %v1943_v34 = vsel %vm1808_vm2, %v1740_v3, 0.0 }
 0x160   : > { %v1944_v25 = vadd.f32 %v1943_v34, %v1942_v16  ;;  %v1411_v26 = vpop.permute.xlu1 %1410  ;;  %v1407_v17 = vpop.permute.xlu0 %1406 }
 0x161   : > { %v1743_v27 = vmul.f32 %v2578_v15, %v1411_v26  ;;  %v1742_v22 = vmul.f32 %v2577_v23, %v1407_v17  ;;  %v2743_v23 = vld [vmem:[%s3335_s9 + $0x128] sm:$0xff]  }
 0x162   : > { %v1946_v33 = vadd.f32 %v1945_v24, %v1944_v25  ;;  %1540 = vbcast.lane.b32.xlu1 %v3418_v37, 368  ;;  %1603 = vbcast.lane.b32.xlu0 %v3430_v54, 360 }
 0x163   : > { %v1949_v35 = vsel %vm1808_vm2, %v1743_v27, 0.0  ;;  %v1947_v36 = vsel %vm1808_vm2, %v1742_v22, 0.0  ;;  %v2602_v27 = vunpack.c.h.bf16 %v2743_v23  ;;  %v2601_v22 = vunpack.c.l.bf16 %v2743_v23 }
 0x164   : > { %v1948_v38 = vadd.f32 %v1947_v36, %v1946_v33  ;;  %v1422_v39 = vpop.permute.xlu1 %1421  ;;  %v1418_v42 = vpop.permute.xlu0 %1417 }
 0x165   : > { %v1745_v45 = vmul.f32 %v2582_v30, %v1422_v39  ;;  %v1744_v46 = vmul.f32 %v2581_v31, %v1418_v42  ;;  %v2744_v31 = vld [vmem:[%s3335_s9 + $0x130] sm:$0xff]  }
 0x166   : > { %v1950_v44 = vadd.f32 %v1949_v35, %v1948_v38  ;;  %1607 = vbcast.lane.b32.xlu1 %v3430_v54, 368  ;;  %1670 = vbcast.lane.b32.xlu0 %v3441_v2, 360 }
 0x167   : > { %v1958_v29 = vsel %vm1808_vm2, %v1745_v45, 0.0  ;;  %v1957_v50 = vsel %vm1808_vm2, %v1744_v46, 0.0  ;;  %v2605_v45 = vunpack.c.l.bf16 %v2744_v31 }
 0x168   : > { %v1951_v51 = vrot.slane %v1950_v44, 4  ;;  %v1959_v19 = vadd.f32 %v1958_v29, %v1957_v50  ;;  %v1430_v52 = vpop.permute.xlu1 %1429  ;;  %v1426_v53 = vpop.permute.xlu0 %1425 }
 0x169   : > { %v1747_v21 = vmul.f32 %v2586_v47, %v1430_v52  ;;  %v1746_v56 = vmul.f32 %v2585_v48, %v1426_v53  ;;  %v2745_v47 = vld [vmem:[%s3335_s9 + $0x138] sm:$0xff]  }
 0x16a   : > { %v1952_v28 = vadd.f32 %v1951_v51, %v1950_v44  ;;  %1674 = vbcast.lane.b32.xlu1 %v3441_v2, 368  ;;  %1544 = vbcast.lane.b32.xlu0 %v3418_v37, 376  ;;  %v2742_v37 = vld [vmem:[%s3335_s9 + $0x120] sm:$0xff]   ;;  %v2610_v52 = vunpack.c.h.bf16 %v2745_v47  ;;  %v2609_v53 = vunpack.c.l.bf16 %v2745_v47 }
 0x16b   : > { %v1962_v59 = vsel %vm1808_vm2, %v1747_v21, 0.0  ;;  %v1960_v41 = vsel %vm1808_vm2, %v1746_v56, 0.0  ;;  %v2598_v14 = vunpack.c.h.bf16 %v2742_v37  ;;  %v2597_v3 = vunpack.c.l.bf16 %v2742_v37 }
 0x16c   : > { %v1953_v43 = vrot.slane %v1952_v28, 2  ;;  %v1961_v60 = vadd.f32 %v1960_v41, %v1959_v19  ;;  %v1438_v61 = vpop.permute.xlu1 %1437  ;;  %v1434_v62 = vpop.permute.xlu0 %1433 }
 0x16d   : > { %v1749_v63 = vmul.f32 %v2590_v57, %v1438_v61  ;;  %v1748_v0 = vmul.f32 %v2589_v58, %v1434_v62 }
 0x16e   : > { %v1954_v40 = vadd.f32 %v1953_v43, %v1952_v28  ;;  %v1963_v5 = vadd.f32 %v1962_v59, %v1961_v60  ;;  %1678 = vbcast.lane.b32.xlu1 %v3441_v2, 376  ;;  %1611 = vbcast.lane.b32.xlu0 %v3430_v54, 376 }
 0x16f   : > { %v1966_v6 = vsel %vm1808_vm2, %v1749_v63, 0.0  ;;  %v1964_v7 = vsel %vm1808_vm2, %v1748_v0, 0.0 }
 0x170   : > { %v1955_v8 = vrot.slane %v1954_v40, 1  ;;  %v1965_v9 = vadd.f32 %v1964_v7, %v1963_v5  ;;  %v1446_v10 = vpop.permute.xlu1 %1445  ;;  %v1442_v11 = vpop.permute.xlu0 %1441 }
 0x171   : > { %v1751_v12 = vmul.f32 %v2594_v1, %v1446_v10  ;;  %v1750_v13 = vmul.f32 %v2593_v4, %v1442_v11 }
 0x172   : > { %v1956_v15 = vadd.f32 %v1955_v8, %v1954_v40  ;;  %v1967_v2 = vadd.f32 %v1966_v6, %v1965_v9  ;;  %v2889_v9 = vld [vmem:[%s3333_s25] sm:$0xff] }
 0x173   : > { %v1970_v54 = vsel %vm1808_vm2, %v1751_v12, 0.0  ;;  %v1968_v16 = vsel %vm1808_vm2, %v1750_v13, 0.0 }
 0x174   : > { %v2118_v18 = vsel %vm2117_vm5, %v1956_v15, %v3549_v55  ;;  %v1969_v24 = vadd.f32 %v1968_v16, %v1967_v2  ;;  %v1454_v34 = vpop.permute.xlu1 %1453  ;;  %v1450_v25 = vpop.permute.xlu0 %1449  ;;  %v2606_v55 = vunpack.c.h.bf16 %v2744_v31  ;;  %v2746_v31 = vld [vmem:[%s3335_s9 + $0x140] sm:$0xff]  }
 0x175   : > { %v1753_v26 = vmul.f32 %v2598_v14, %v1454_v34  ;;  %v1752_v17 = vmul.f32 %v2597_v3, %v1450_v25 }
 0x176   : > { %v1971_v30 = vadd.f32 %v1970_v54, %v1969_v24 }
 0x177   : > { %v1974_v33 = vsel %vm1808_vm2, %v1753_v26, 0.0  ;;  %v1972_v32 = vsel %vm1808_vm2, %v1752_v17, 0.0 }
 0x178   : > { %v1973_v35 = vadd.f32 %v1972_v32, %v1971_v30  ;;  %v1462_v36 = vpop.permute.xlu1 %1461  ;;  %v1458_v38 = vpop.permute.xlu0 %1457  ;;  %v3652_v32 = vld [vmem:[%s3335_s9 + $0x148] sm:$0xff]  }
 0x179   : > { %v1755_v39 = vmul.f32 %v2602_v27, %v1462_v36  ;;  %v1754_v42 = vmul.f32 %v2601_v22, %v1458_v38  ;;  %v3659_v38 = vld [vmem:[%s3335_s9 + $0x1c0] sm:$0xff]  }
 0x17a   : > { %v1975_v46 = vadd.f32 %v1974_v33, %v1973_v35  ;;  %v3649_v33 = vld [vmem:[%s3335_s9 + $0x180] sm:$0xff]  }
 0x17b   : > { %v1978_v48 = vsel %vm1808_vm2, %v1755_v39, 0.0  ;;  %v1976_v44 = vsel %vm1808_vm2, %v1754_v42, 0.0  ;;  %v3662_v39 = vld [vmem:[%s3335_s9 + $0x188] sm:$0xff]   ;;  %v2645_v47 = vunpack.c.l.bf16 %v3649_v33 }
 0x17c   : > { %v1977_v49 = vadd.f32 %v1976_v44, %v1975_v46  ;;  %v1470_v29 = vpop.permute.xlu1 %1469  ;;  %v1466_v50 = vpop.permute.xlu0 %1465  ;;  %v3665_v42 = vld [vmem:[%s3335_s9 + $0x1c8] sm:$0xff]   ;;  %v2613_v46 = vunpack.c.l.bf16 %v2746_v31  ;;  %v3673_v44 = vld [vmem:[%s3335_s9 + $0x190] sm:$0xff]  }
 0x17d   : > { %v1757_v51 = vmul.f32 %v2606_v55, %v1470_v29  ;;  %v1756_v19 = vmul.f32 %v2605_v45, %v1466_v50  ;;  %v3668_v55 = vld [vmem:[%s3335_s9 + $0x150] sm:$0xff]   ;;  %v2614_v45 = vunpack.c.h.bf16 %v2746_v31  ;;  %v2677_v29 = vunpack.c.l.bf16 %v3659_v38 }
 0x17e   : > { %v1979_v21 = vadd.f32 %v1978_v48, %v1977_v49  ;;  %v2617_v48 = vunpack.c.l.bf16 %v3652_v32  ;;  %v3676_v49 = vld [vmem:[%s3335_s9 + $0x1d0] sm:$0xff]   ;;  %v2646_v50 = vunpack.c.h.bf16 %v3649_v33 }
 0x17f   : > { %v1982_v56 = vsel %vm1808_vm2, %v1757_v51, 0.0  ;;  %v1980_v57 = vsel %vm1808_vm2, %v1756_v19, 0.0  ;;  %v3748_v19 = vld [vmem:[%s3335_s9 + $0x1f0] sm:$0xff]   ;;  %v3755_v51 = vld [vmem:[%s3335_s9 + $0x178] sm:$0xff]  }
 0x180   : > { %v1981_v58 = vadd.f32 %v1980_v57, %v1979_v21  ;;  %v1478_v28 = vpop.permute.xlu1 %1477  ;;  %v1474_v20 = vpop.permute.xlu0 %1473  ;;  %v2681_v57 = vunpack.c.l.bf16 %v3665_v42 }
 0x181   : > { %v1759_v59 = vmul.f32 %v2610_v52, %v1478_v28  ;;  %v1758_v41 = vmul.f32 %v2609_v53, %v1474_v20  ;;  %v3683_v52 = vld [vmem:[%s3335_s9 + $0x158] sm:$0xff]  }
 0x182   : > { %v1983_v43 = vadd.f32 %v1982_v56, %v1981_v58  ;;  %v3686_v53 = vld [vmem:[%s3335_s9 + $0x198] sm:$0xff]  }
 0x183   : > { %v1986_v60 = vsel %vm1808_vm2, %v1759_v59, 0.0  ;;  %v1984_v61 = vsel %vm1808_vm2, %v1758_v41, 0.0  ;;  %v3697_v59 = vld [vmem:[%s3335_s9 + $0x1d8] sm:$0xff]   ;;  %v3700_v41 = vld [vmem:[%s3335_s9 + $0x160] sm:$0xff]  }
 0x184   : > { %v1985_v62 = vadd.f32 %v1984_v61, %v1983_v43  ;;  %v3600_v63 = vpop.permute.xlu1 %1488  ;;  %v3602_v0 = vpop.permute.xlu0 %1484  ;;  %v3738_v43 = vld [vmem:[%s3335_s9 + $0x170] sm:$0xff]  }
 0x185   : > { %v1760_v31 = vmul.f32 %v2613_v46, %v3602_v0  ;;  %v3785_v46 = vld [vmem:[%s3335_s9 + $0x1f8] sm:$0xff]  }
 0x186   : > { %v1987_v1 = vadd.f32 %v1986_v60, %v1985_v62  ;;  %v3741_v62 = vld [vmem:[%s3335_s9 + $0x1b0] sm:$0xff]   ;;  %v1761_v60 = vmul.f32 %v2614_v45, %v3600_v63 }
 0x188   : > { %v1988_v4 = vrot.slane %v1987_v1, 4  ;;  %v3604_v40 = vpop.permute.xlu1 %1551  ;;  %v3606_v5 = vpop.permute.xlu0 %1492  ;;  %v1995_v63 = vsel %vm1808_vm2, %v1761_v60, 0.0  ;;  %v4084_v60 = vunpack.c.l.bf16 %v3668_v55 }
 0x189   : > { %v1762_v0 = vmul.f32 %v2617_v48, %v3606_v5  ;;  %v1994_v5 = vsel %vm1808_vm2, %v1760_v31, 0.0  ;;  %v2705_v31 = vunpack.c.l.bf16 %v3785_v46 }
 0x18a   : > { %v1989_v37 = vadd.f32 %v1988_v4, %v1987_v1  ;;  %v3707_v1 = vld [vmem:[%s3335_s9 + $0x1a0] sm:$0xff]  }
 0x18b   : > { %v3710_v4 = vld [vmem:[%s3335_s9 + $0x1e0] sm:$0xff]  }
 0x18c   : > { %v1990_v6 = vrot.slane %v1989_v37, 2  ;;  %v3608_v7 = vpop.permute.xlu1 %1618  ;;  %v3610_v8 = vpop.permute.xlu0 %1555 }
 0x18d   : > { %2131 = vadd.xlane.f32.xlu0 %v2889_v9  ;;  %v3731_v9 = vld [vmem:[%s3335_s9 + $0x1e8] sm:$0xff]   ;;  %v1777_v45 = vmul.f32 %v2646_v50, %v3610_v8  ;;  %v4080_v8 = vunpack.c.l.bf16 %v3662_v39  ;;  %v4081_v50 = vunpack.c.h.bf16 %v3659_v38 }
 0x18e   : > { %v1991_v10 = vadd.f32 %v1990_v6, %v1989_v37  ;;  %v1776_v37 = vmul.f32 %v2645_v47, %v3604_v40  ;;  %v3770_v40 = vld [vmem:[%s3335_s9 + $0x1b8] sm:$0xff]   ;;  %v1792_v47 = vmul.f32 %v2677_v29, %v3608_v7 }
 0x190   : > { %v1992_v11 = vrot.slane %v1991_v10, 1  ;;  %v3613_v12 = vpop.permute.xlu1 %1559  ;;  %v3615_v13 = vpop.permute.xlu0 %1622  ;;  %v2031_v7 = vsel %vm1808_vm2, %v1776_v37, 0.0  ;;  %v4083_v37 = vunpack.c.h.bf16 %v3662_v39 }
 0x191   : > { %v1778_v48 = vmul.f32 %v4080_v8, %v3613_v12  ;;  %v1793_v33 = vmul.f32 %v4081_v50, %v3615_v13  ;;  %v1997_v12 = vsel %vm1808_vm2, %v1762_v0, 0.0  ;;  %v2032_v8 = vsel %vm1808_vm2, %v1777_v45, 0.0 }
 0x192   : > { %v1993_v14 = vadd.f32 %v1992_v11, %v1991_v10  ;;  %v3717_v11 = vld [vmem:[%s3335_s9 + $0x168] sm:$0xff]   ;;  %v4082_v13 = vunpack.c.h.bf16 %v3652_v32  ;;  %v2068_v50 = vsel %vm1808_vm2, %v1792_v47, 0.0  ;;  %v2033_v47 = vadd.f32 %v2032_v8, %v2031_v7 }
 0x193   : > { %v2034_v0 = vsel %vm1808_vm2, %v1778_v48, 0.0  ;;  %v2069_v45 = vsel %vm1808_vm2, %v1793_v33, 0.0 }
 0x194   : > { %v3617_v3 = vsel %vm2119_vm6, %v1993_v14, %v2118_v18  ;;  %v3619_v15 = vpop.permute.xlu1 %1626  ;;  %v3621_v2 = vpop.permute.xlu0 %1496  ;;  %v3720_v14 = vld [vmem:[%s3335_s9 + $0x1a8] sm:$0xff]  }
 0x195   : > { %4079 = vst [vmem:[#allocation19_spill] sm:$0xff] %v3617_v3  ;;  %v1794_v29 = vmul.f32 %v2681_v57, %v3619_v15  ;;  %v1763_v38 = vmul.f32 %v4082_v13, %v3621_v2  ;;  %v1996_v57 = vadd.f32 %v1995_v63, %v1994_v5  ;;  %v4085_v2 = vunpack.c.l.bf16 %v3673_v44 }
 0x197   : > { %v1998_v63 = vadd.f32 %v1997_v12, %v1996_v57  ;;  %v2071_v5 = vsel %vm1808_vm2, %v1794_v29, 0.0  ;;  %v1999_v33 = vsel %vm1808_vm2, %v1763_v38, 0.0  ;;  %v2035_v29 = vadd.f32 %v2034_v0, %v2033_v47 }
 0x198   : > { %v3623_v23 = vpop.permute.xlu1 %1500  ;;  %v3625_v54 = vpop.permute.xlu0 %1563  ;;  %v2070_v12 = vadd.f32 %v2069_v45, %v2068_v50 }
 0x199   : > { %v1779_v15 = vmul.f32 %v4083_v37, %v3625_v54  ;;  %v1764_v10 = vmul.f32 %v4084_v60, %v3623_v23  ;;  %v4086_v54 = vunpack.c.h.bf16 %v3665_v42  ;;  %v4087_v23 = vunpack.c.l.bf16 %v3676_v49 }
 0x19a   : > { %v2072_v0 = vadd.f32 %v2071_v5, %v2070_v12  ;;  %v2000_v50 = vadd.f32 %v1999_v33, %v1998_v63 }
 0x19b   : > { %v2036_v37 = vsel %vm1808_vm2, %v1779_v15, 0.0  ;;  %v2001_v8 = vsel %vm1808_vm2, %v1764_v10, 0.0 }
 0x19c   : > { %v3627_v16 = vpop.permute.xlu1 %1567  ;;  %v3629_v24 = vpop.permute.xlu0 %1630  ;;  %v2037_v45 = vadd.f32 %v2036_v37, %v2035_v29  ;;  %v4095_v37 = vunpack.c.l.bf16 %v3697_v59 }
 0x19d   : > { %v1780_v32 = vmul.f32 %v4085_v2, %v3627_v16  ;;  %v1795_v39 = vmul.f32 %v4086_v54, %v3629_v24  ;;  %v4088_v16 = vunpack.c.h.bf16 %v3668_v55  ;;  %v4089_v24 = vunpack.c.h.bf16 %v3673_v44 }
 0x19e   : > { %v4091_v55 = vunpack.c.l.bf16 %v3686_v53  ;;  %v4092_v44 = vunpack.c.h.bf16 %v3676_v49 }
 0x19f   : > { %v2038_v38 = vsel %vm1808_vm2, %v1780_v32, 0.0  ;;  %v2073_v15 = vsel %vm1808_vm2, %v1795_v39, 0.0  ;;  %v4093_v39 = vunpack.c.h.bf16 %v3683_v52 }
 0x1a0   : > { %v3631_v34 = vpop.permute.xlu1 %1634  ;;  %v3633_v18 = vpop.permute.xlu0 %1504  ;;  %v2039_v5 = vadd.f32 %v2038_v38, %v2037_v45  ;;  %v2074_v63 = vadd.f32 %v2073_v15, %v2072_v0  ;;  %v4100_v0 = vunpack.c.l.bf16 %v3710_v4 }
 0x1a1   : > { %v1796_v60 = vmul.f32 %v4087_v23, %v3631_v34  ;;  %v1765_v42 = vmul.f32 %v4088_v16, %v3633_v18  ;;  %v4090_v34 = vunpack.c.l.bf16 %v3683_v52 }
 0x1a3   : > { %v2075_v10 = vsel %vm1808_vm2, %v1796_v60, 0.0 }
 0x1a4   : > { %v3635_v25 = vpop.permute.xlu1 %1508  ;;  %v3637_v26 = vpop.permute.xlu0 %1571 }
 0x1a5   : > { %v1781_v7 = vmul.f32 %v4089_v24, %v3637_v26  ;;  %v1766_v57 = vmul.f32 %v4090_v34, %v3635_v25  ;;  %v2003_v25 = vsel %vm1808_vm2, %v1765_v42, 0.0  ;;  %v2076_v42 = vadd.f32 %v2075_v10, %v2074_v63 }
 0x1a6   : > { %v4097_v24 = vunpack.c.l.bf16 %v3707_v1  ;;  %v4102_v10 = vunpack.c.h.bf16 %v3707_v1 }
 0x1a7   : > { %v2040_v32 = vsel %vm1808_vm2, %v1781_v7, 0.0  ;;  %v2005_v23 = vsel %vm1808_vm2, %v1766_v57, 0.0 }
 0x1a8   : > { %v3639_v17 = vpop.permute.xlu1 %1575  ;;  %v3641_v27 = vpop.permute.xlu0 %1638 }
 0x1a9   : > { %v1782_v18 = vmul.f32 %v4091_v55, %v3639_v17  ;;  %v1797_v26 = vmul.f32 %v4092_v44, %v3641_v27  ;;  %v4094_v17 = vunpack.c.h.bf16 %v3686_v53  ;;  %v2002_v27 = vadd.f32 %v2001_v8, %v2000_v50 }
 0x1aa   : > { %v2642_v44 = vunpack.c.h.bf16 %v3755_v51 }
 0x1ab   : > { %v2042_v60 = vsel %vm1808_vm2, %v1782_v18, 0.0  ;;  %v2077_v33 = vsel %vm1808_vm2, %v1797_v26, 0.0  ;;  %v2004_v53 = vadd.f32 %v2003_v25, %v2002_v27 }
 0x1ac   : > { %v3643_v22 = vpop.permute.xlu1 %1642  ;;  %v3645_v30 = vpop.permute.xlu0 %1512  ;;  %v2078_v18 = vadd.f32 %v2077_v33, %v2076_v42 }
 0x1ad   : > { %v1767_v47 = vmul.f32 %v4093_v39, %v3645_v30  ;;  %v1798_v16 = vmul.f32 %v4095_v37, %v3643_v22  ;;  %v4096_v30 = vunpack.c.l.bf16 %v3700_v41  ;;  %v4098_v22 = vunpack.c.h.bf16 %v3697_v59 }
 0x1ae   : > { %v2006_v15 = vadd.f32 %v2005_v23, %v2004_v53  ;;  %v4105_v23 = vunpack.c.l.bf16 %v3720_v14 }
 0x1af   : > { %v2007_v8 = vsel %vm1808_vm2, %v1767_v47, 0.0 }
 0x1b0   : > { %v3654_v35 = vpop.permute.xlu1 %1516  ;;  %v3656_v36 = vpop.permute.xlu0 %1579  ;;  %v2008_v45 = vadd.f32 %v2007_v8, %v2006_v15  ;;  %v4110_v8 = vunpack.c.h.bf16 %v3738_v43  ;;  %v4112_v15 = vunpack.c.l.bf16 %v3748_v19 }
 0x1b1   : > { %v1783_v49 = vmul.f32 %v4094_v17, %v3656_v36  ;;  %v1768_v52 = vmul.f32 %v4096_v30, %v3654_v35  ;;  %v2041_v36 = vadd.f32 %v2040_v32, %v2039_v5  ;;  %v4099_v35 = vunpack.c.h.bf16 %v3700_v41 }
 0x1b3   : > { %v2044_v34 = vsel %vm1808_vm2, %v1783_v49, 0.0  ;;  %v2043_v55 = vadd.f32 %v2042_v60, %v2041_v36  ;;  %v2009_v26 = vsel %vm1808_vm2, %v1768_v52, 0.0  ;;  %v4108_v52 = vunpack.c.h.bf16 %v3720_v14 }
 0x1b4   : > { %v3688_v21 = vpop.permute.xlu1 %1583  ;;  %v3690_v56 = vpop.permute.xlu0 %1646  ;;  %v2010_v63 = vadd.f32 %v2009_v26, %v2008_v45  ;;  %v4114_v45 = vunpack.c.h.bf16 %v3741_v62 }
 0x1b5   : > { %v1784_v7 = vmul.f32 %v4097_v24, %v3688_v21  ;;  %v1799_v57 = vmul.f32 %v4098_v22, %v3690_v56  ;;  %v2079_v21 = vsel %vm1808_vm2, %v1798_v16, 0.0  ;;  %v4101_v56 = vunpack.c.l.bf16 %v3717_v11 }
 0x1b6   : > { %v2045_v41 = vadd.f32 %v2044_v34, %v2043_v55  ;;  %v2080_v5 = vadd.f32 %v2079_v21, %v2078_v18  ;;  %v4109_v24 = vunpack.c.h.bf16 %v3731_v9 }
 0x1b7   : > { %v2081_v47 = vsel %vm1808_vm2, %v1799_v57, 0.0 }
 0x1b8   : > { %v3726_v6 = vpop.permute.xlu1 %1650  ;;  %v3728_v61 = vpop.permute.xlu0 %1520 }
 0x1b9   : > { %v1769_v38 = vmul.f32 %v4099_v35, %v3728_v61  ;;  %v1800_v50 = vmul.f32 %v4100_v0, %v3726_v6  ;;  %v2046_v61 = vsel %vm1808_vm2, %v1784_v7, 0.0  ;;  %v4103_v6 = vunpack.c.h.bf16 %v3710_v4 }
 0x1ba   : > { %v2047_v33 = vadd.f32 %v2046_v61, %v2045_v41  ;;  %v4115_v41 = vunpack.c.h.bf16 %v3748_v19 }
 0x1bb   : > { %v2011_v17 = vsel %vm1808_vm2, %v1769_v38, 0.0  ;;  %v2083_v37 = vsel %vm1808_vm2, %v1800_v50, 0.0 }
 0x1bc   : > { %v3758_v28 = vpop.permute.xlu1 %1524  ;;  %v3760_v20 = vpop.permute.xlu0 %1587 }
 0x1bd   : > { %v1770_v59 = vmul.f32 %v4101_v56, %v3758_v28  ;;  %v1785_v25 = vmul.f32 %v4102_v10, %v3760_v20  ;;  %v4104_v28 = vunpack.c.h.bf16 %v3717_v11  ;;  %v4106_v20 = vunpack.c.l.bf16 %v3731_v9 }
 0x1be   : > { %v2082_v11 = vadd.f32 %v2081_v47, %v2080_v5  ;;  %v4113_v9 = vunpack.c.l.bf16 %v3755_v51 }
 0x1bf   : > { %v2013_v16 = vsel %vm1808_vm2, %v1770_v59, 0.0  ;;  %v2048_v30 = vsel %vm1808_vm2, %v1785_v25, 0.0 }
 0x1c0   : > { %v3789_v58 = vpop.permute.xlu1 %1591  ;;  %v3791_v3 = vpop.permute.xlu0 %1654  ;;  %v2049_v18 = vadd.f32 %v2048_v30, %v2047_v33 }
 0x1c1   : > { %v1801_v49 = vmul.f32 %v4103_v6, %v3791_v3  ;;  %v1786_v1 = vmul.f32 %v4105_v23, %v3789_v58  ;;  %v4107_v3 = vunpack.c.l.bf16 %v3738_v43  ;;  %v2674_v23 = vunpack.c.h.bf16 %v3770_v40 }
 0x1c3   : > { %v2085_v36 = vsel %vm1808_vm2, %v1801_v49, 0.0  ;;  %v2050_v57 = vsel %vm1808_vm2, %v1786_v1, 0.0  ;;  %v4116_v49 = vunpack.c.l.bf16 %v3770_v40 }
 0x1c4   : > { %v3820_v13 = vpop.permute.xlu1 %1658  ;;  %v1529_v48 = vpop.permute.xlu0 %1528  ;;  %v2051_v10 = vadd.f32 %v2050_v57, %v2049_v18 }
 0x1c5   : > { %v1771_v27 = vmul.f32 %v4104_v28, %v1529_v48  ;;  %v1802_v60 = vmul.f32 %v4106_v20, %v3820_v13  ;;  %v2012_v48 = vadd.f32 %v2011_v17, %v2010_v63 }
 0x1c7   : > { %v2015_v13 = vsel %vm1808_vm2, %v1771_v27, 0.0  ;;  %v2014_v22 = vadd.f32 %v2013_v16, %v2012_v48  ;;  %v2087_v35 = vsel %vm1808_vm2, %v1802_v60, 0.0 }
 0x1c8   : > { %v1533_v2 = vpop.permute.xlu1 %1532  ;;  %v1596_v54 = vpop.permute.xlu0 %1595 }
 0x1c9   : > { %v1772_v4 = vmul.f32 %v4107_v3, %v1533_v2  ;;  %v1787_v42 = vmul.f32 %v4108_v52, %v1596_v54  ;;  %v2084_v2 = vadd.f32 %v2083_v37, %v2082_v11  ;;  %v4111_v54 = vunpack.c.l.bf16 %v3741_v62 }
 0x1ca   : > { %v2016_v21 = vadd.f32 %v2015_v13, %v2014_v22 }
 0x1cb   : > { %v2017_v14 = vsel %vm1808_vm2, %v1772_v4, 0.0  ;;  %v2086_v43 = vadd.f32 %v2085_v36, %v2084_v2  ;;  %v2052_v26 = vsel %vm1808_vm2, %v1787_v42, 0.0 }
 0x1cc   : > { %v1600_v29 = vpop.permute.xlu1 %1599  ;;  %v1663_v12 = vpop.permute.xlu0 %1662  ;;  %v2053_v27 = vadd.f32 %v2052_v26, %v2051_v10 }
 0x1cd   : > { %v1803_v7 = vmul.f32 %v4109_v24, %v1663_v12  ;;  %v1788_v38 = vmul.f32 %v4111_v54, %v1600_v29  ;;  %v2088_v25 = vadd.f32 %v2087_v35, %v2086_v43 }
 0x1cf   : > { %v2089_v56 = vsel %vm1808_vm2, %v1803_v7, 0.0  ;;  %v2054_v47 = vsel %vm1808_vm2, %v1788_v38, 0.0 }
 0x1d0   : > { %v1667_v32 = vpop.permute.xlu1 %1666  ;;  %v1537_v39 = vpop.permute.xlu0 %1536  ;;  %v2090_v62 = vadd.f32 %v2089_v56, %v2088_v25  ;;  %v2055_v37 = vadd.f32 %v2054_v47, %v2053_v27  ;;  %v1143_v56 = vld [vmem:[#allocation2] sm:$0xff]  ;;  %v2153_v27 = vld [vmem:[%s4056_s3 + $0x18] sm:$0xff] (!%p2441_p6) }
 0x1d1   : > { %v1773_v34 = vmul.f32 %v4110_v8, %v1537_v39  ;;  %v1804_v55 = vmul.f32 %v4112_v15, %v1667_v32  ;;  %v2018_v32 = vadd.f32 %v2017_v14, %v2016_v21  ;;  %v2706_v39 = vunpack.c.h.bf16 %v3785_v46  ;;  %v2150_v47 = vld [vmem:[%s4056_s3] sm:$0xff] (!%p2441_p6) }
 0x1d3   : > { %v2019_v59 = vsel %vm1808_vm2, %v1773_v34, 0.0  ;;  %v2091_v17 = vsel %vm1808_vm2, %v1804_v55, 0.0 }
 0x1d4   : > { %v1541_v58 = vpop.permute.xlu1 %1540  ;;  %v1604_v53 = vpop.permute.xlu0 %1603  ;;  %v2020_v5 = vadd.f32 %v2019_v59, %v2018_v32  ;;  %v2092_v16 = vadd.f32 %v2091_v17, %v2090_v62  ;;  %v3042_v32 = vmov (!%p2441_p6), 0   ;;  %v2151_v17 = vld [vmem:[%s4056_s3 + $0x8] sm:$0xff] (!%p2441_p6)  ;;  %v3045_v62 = vmov (!%p2441_p6), 0.0  }
 0x1d5   : > { %v1774_v12 = vmul.f32 %v4113_v9, %v1541_v58  ;;  %v1789_v29 = vmul.f32 %v4114_v45, %v1604_v53  ;;  %2890 = vset.pattern.permute.xlu0 (!%p2441_p6), %v3042_v32  ;;  %2783 = vmatprep.mubr.msk.f32.mxu0 (!%p2441_p6), %vm3044_vm11, %v3045_v62 }
 0x1d7   : > { %v2021_v6 = vsel %vm1808_vm2, %v1774_v12, 0.0  ;;  %v2056_v1 = vsel %vm1808_vm2, %v1789_v29, 0.0 }
 0x1d8   : > { %v1608_v0 = vpop.permute.xlu1 %1607  ;;  %v1671_v50 = vpop.permute.xlu0 %1670  ;;  %v2022_v3 = vadd.f32 %v2021_v6, %v2020_v5  ;;  %v2057_v40 = vadd.f32 %v2056_v1, %v2055_v37  ;;  %v2152_v6 = vld [vmem:[%s4056_s3 + $0x10] sm:$0xff] (!%p2441_p6) }
 0x1d9   : > { %v1805_v61 = vmul.f32 %v4115_v41, %v1671_v50  ;;  %v1790_v28 = vmul.f32 %v4116_v49, %v1608_v0  ;;  %v4117_v0 = vld [vmem:[#allocation19_spill] sm:$0xff]  ;;  %v2130_v41 = vld [vmem:[#allocation3] sm:$0xff]  ;;  %v3043_v49 = vmov (!%p2441_p6), 0.0|0.0   ;;  %v2790_v5 = vpack.c.bf16 (!%p2441_p6), %v2153_v27, %v2152_v6 }
 0x1da   : > { %2786 = vmatprep.subr.bf16.mxu0 (!%p2441_p6), %v3043_v49 }
 0x1db   : > { %v2093_v20 = vsel %vm1808_vm2, %v1805_v61, 0.0  ;;  %v2058_v4 = vsel %vm1808_vm2, %v1790_v28, 0.0  ;;  %v2787_v28 = vpack.c.bf16 (!%p2441_p6), %v2151_v17, %v2150_v47 }
 0x1dc   : > { %v1675_v63 = vpop.permute.xlu1 %1674  ;;  %v1545_v19 = vpop.permute.xlu0 %1544  ;;  %v2094_v30 = vadd.f32 %v2093_v20, %v2092_v16  ;;  %v2442_v20 = vld [vmem:[%s4057_s4] ss:$0 sm:$0xff] (!%p2441_p6) }
 0x1dd   : > { %v1806_v60 = vmul.f32 %v2705_v31, %v1675_v63  ;;  %v1775_v33 = vmul.f32 %v2642_v44, %v1545_v19  ;;  %v2059_v31 = vadd.f32 %v2058_v4, %v2057_v40  ;;  %2788 = vmatpush3.bf16.msra.mxu0 (!%p2441_p6), %v2787_v28 }
 0x1de   : > { %2789 = vmatprep.subr.bf16.mxu0 (!%p2441_p6), %v3043_v49 }
 0x1df   : > { %v2095_v11 = vsel %vm1808_vm2, %v1806_v60, 0.0  ;;  %v2023_v48 = vsel %vm1808_vm2, %v1775_v33, 0.0 }
 0x1e0   : > { %v2024_v52 = vadd.f32 %v2023_v48, %v2022_v3  ;;  %v1679_v42 = vpop.permute.xlu1 %1678  ;;  %v1612_v58 = vpop.permute.xlu0 %1611  ;;  %v2096_v36 = vadd.f32 %v2095_v11, %v2094_v30 }
 0x1e1   : > { %v1807_v53 = vmul.f32 %v2706_v39, %v1679_v42  ;;  %v1791_v46 = vmul.f32 %v2674_v23, %v1612_v58  ;;  %2791 = vmatpush3.bf16.msra.mxu0 (!%p2441_p6), %v2790_v5 }
 0x1e2   : > { %v2025_v51 = vrot.slane %v2024_v52, 4 }
 0x1e3   : > { %v2097_v44 = vsel %vm1808_vm2, %v1807_v53, 0.0  ;;  %v2060_v13 = vsel %vm1808_vm2, %v1791_v46, 0.0 }
 0x1e4   : > { %v2026_v24 = vadd.f32 %v2025_v51, %v2024_v52  ;;  %v2098_v7 = vadd.f32 %v2097_v44, %v2096_v36  ;;  %v2061_v8 = vadd.f32 %v2060_v13, %v2059_v31  ;;  %v2245_v52 = vld [vmem:[%s3328_s29] sm:$0xff] (!%p2441_p6) }
 0x1e6   : > { %v2027_v34 = vrot.slane %v2026_v24, 2  ;;  %v2099_v2 = vrot.slane %v2098_v7, 4  ;;  %v2062_v22 = vrot.slane %v2061_v8, 4 }
 0x1e8   : > { %v2028_v57 = vadd.f32 %v2027_v34, %v2026_v24  ;;  %v2100_v35 = vadd.f32 %v2099_v2, %v2098_v7  ;;  %v2063_v14 = vadd.f32 %v2062_v22, %v2061_v8 }
 0x1ea   : > { %v2029_v54 = vrot.slane %v2028_v57, 1  ;;  %v2101_v38 = vrot.slane %v2100_v35, 2  ;;  %v2064_v15 = vrot.slane %v2063_v14, 2 }
 0x1ec   : > { %v2102_v55 = vadd.f32 %v2101_v38, %v2100_v35  ;;  %v2065_v9 = vadd.f32 %v2064_v15, %v2063_v14  ;;  %v2030_v12 = vadd.f32 %v2029_v54, %v2028_v57 }
 0x1ee   : > { %v2103_v18 = vrot.slane %v2102_v55, 1  ;;  %v2066_v43 = vrot.slane %v2065_v9, 1  ;;  %v2122_v50 = vsel %vm2121_vm7, %v2030_v12, %v4117_v0 }
 0x1f0   : > { %v2104_v21 = vadd.f32 %v2103_v18, %v2102_v55  ;;  %v2067_v26 = vadd.f32 %v2066_v43, %v2065_v9 }
 0x1f2   : > { %v2124_v59 = vsel %vm2123_vm8, %v2067_v26, %v2122_v50 }
 0x1f3   : > { %v2126_v45 = vsel %vm2125_vm9, %v2104_v21, %v2124_v59 }
 0x1f4   : > { %v2128_v29 = vadd.f32 %v2126_v45, %v1143_v56 }
 0x1f6   : > { %2129 = vst.msk [vmem:[#allocation2] sm:$0xff] %vm1808_vm2, %v2128_v29 }
 0x1fd   : > { %v2140_v19 = vld [vmem:[#allocation2] sm:$0xff] (!%p2441_p6) }
 0x217   : > { %2139 = sbr.rel (%p2441_p6) target bundleno = 1367 (0x557), region = 89 }
 0x21a   : > { %v2132_v61 = vpop.xlane.xlu0 %2131 }
 0x21b   : > { %v2133_v10 = vadd.f32 %v2132_v61, %v2130_v41 }
 0x21d   : > { %2135 = vst.msk [vmem:[#allocation3] sm:$0xff] %vm2134_vm10, %v2133_v10 }
 0x224   : > { %v2141_v25 = vld [vmem:[#allocation3] sm:$0xff] }
 0x225   : > { %v2142_v39 = vmax.f32 %v2141_v25, 1e-09 }
 0x227   : > { %2145 = vperm.xlu0 %2890, %v2142_v39  }
 0x2a6   : > { %v2146_v63 = vpop.permute.xlu0 %2145 }
 0x2a7   : > { %2891 = vrcp.f32 %v2146_v63 }
 0x2b1   : > { %v2892_v23 = vpop.eup %2891 }
 0x2b2   : > { %v2149_v1 = vmul.f32 %v2892_v23, %v2140_v19 }
 0x2b4   : > { %2784 = vmatmul.mubr.msk.f32.vlgmr.msra.gmra.mrb[0].mxu0 %vm1808_vm2, %v2149_v1 }
 0x387   : > { %v2230_v60 = vpop.f32.mrb[0].mxu0 }
 0x388   : > { %v2231_v33 = vadd.f32 %v2442_v20, %v2230_v60  ;;  %v2785_v37 = vpop.f32.mrb[1].mxu0 }
 0x38a   : > { %2234 = vmax.xlane.f32.xlu0 %v2231_v33 }
 0x417   : > { %v2235_v16 = vpop.xlane.xlu0 %2234 }
 0x418   : > { %v2236_v3 = vsub.f32 %v2231_v33, %v2235_v16 }
 0x41a   : > { %v2237_v4 = vmul.f32 1.442695, %v2236_v3 }
 0x41c   : > { %2893 = vpow2.f32 %v2237_v4 }
 0x426   : > { %v2894_v11 = vpop.eup %2893 }
 0x427   : > { %2239 = vadd.xlane.f32.xlu1 %v2894_v11 }
 0x4b4   : > { %v2240_v48 = vpop.xlane.xlu1 %2239 }
 0x4b5   : > { %2895 = vlog2.f32 %v2240_v48 }
 0x4bf   : > { %v2896_v40 = vpop.eup %2895 }
 0x4c0   : > { %v2242_v30 = vmul.f32 0.6931472, %v2896_v40 }
 0x4c2   : > { %v2243_v42 = vsub.f32 %v2236_v3, %v2242_v30 }
 0x4c4   : > { %v2246_v58 = vmul.f32 %v2245_v52, %v2243_v42  ;;  %2244 = vst [vmem:[%s3337_s19] sm:$0xff] %v2243_v42 }
 0x4c6   : > { %2247 = vadd.xlane.f32.xlu1 %v2246_v58 }
 0x553   : > { %v2248_v53 = vpop.xlane.xlu1 %2247 }
 0x554   : > { %v2249_v46 = vsub.f32 0.0, %v2248_v53 }
 0x556   : > { %2250 = vst [vmem:[%s3339_s23] sm:$0xff] %v2249_v46 }
 0x557 PF: > { %s2446_s14 = sshll.u32 %s3027_s27, 7  ;;  %s2270_s29 = sshll.u32 %s3337_s19, 4  ;;  %s2271_s29 = int_to_ptr.vmem [resolvable:$true] %s2270_s29 }
 0x558   : > { %s3972_s24 = scalar_lea.hbm %s4058_s5, %s2446_s14  ;;  %s2252_s9 = scalar_lea.sflag [#allocation6], %s3318_s10 }
 0x559   : > { %s2897_s0 = scalar_lea.vmem %s2271_s29, 128  ;;  %s3046_s25 = smov [#allocation5]  }
 0x55a   : > { %p2898_p8 = scmp.ne.s32.totalorder %s2271_s29, %s2897_s0  ;;  %s2901_s28 = sshll.u32 %s3046_s25, 4  ;;  %s2902_s28 = int_to_ptr.vmem [resolvable:$false] %s2901_s28 }
 0x55b   : > { %s2903_s20 = scalar_lea.vmem %s2902_s28, 256  ;;  %p2904_p11 = scmp.lt.s32.totalorder %s2271_s29, %s2902_s28 }
 0x55c   : > { %p2899_p9 = pnand %p2898_p8, %p3155_p7  ;;  %p2905_p13 = scmp.lt.s32.totalorder %s2903_s20, %s2897_s0 }
 0x55e   : > { %p2900_p10 = pneg %p2899_p9  ;;  %p2906_p0 = por %p2905_p13, %p2904_p11 }
 0x560   : > { %p2907_p1 = pnand %p2906_p0, %p2900_p10 }
 0x562   : > { %2910 = shalt.err (!%p2907_p1)
}
 0x563   : > { %s2911_s19 = scalar_lea.hbm %s3972_s24, 128  ;;  %s2915_s26 = scalar_lea.hbm %s4058_s5, 256 }
 0x564   : > { %p2912_p2 = scmp.ne.s32.totalorder %s3972_s24, %s2911_s19  ;;  %p2916_p5 = scmp.lt.u32.totalorder %s3972_s24, %s4058_s5 }
 0x565   : > { %p2917_p6 = scmp.lt.u32.totalorder %s2915_s26, %s2911_s19  ;;  %p2919_p9 = scmp.lt.u32.totalorder %s2911_s19, %s3972_s24 }
 0x566   : > { %p2913_p3 = pnand %p2912_p2, %p3155_p7 }
 0x567   : > { %p2918_p8 = por %p2917_p6, %p2916_p5 }
 0x568   : > { %p2914_p4 = pneg %p2913_p3 }
 0x569   : > { %p2920_p10 = por %p2919_p9, %p2918_p8 }
 0x56b   : > { %p2921_p11 = pnand %p2920_p10, %p2914_p4 }
 0x56d   : > { %2924 = shalt.err (!%p2921_p11)
}
 0x56e   : > { %2792 = dma.vmem_to_hbm [thread:$0]  (%p3155_p7), %s2271_s29, 128, %s3972_s24, %s2252_s9  }
 0x56f   : > { %s3998_s13 = scalar_lea.hbm %s4059_s6, %s2446_s14  ;;  %s2283_s0 = sshll.u32 %s3339_s23, 4  ;;  %s2284_s0 = int_to_ptr.vmem [resolvable:$true] %s2283_s0 }
 0x570   : > { %s2257_s25 = scalar_lea.sflag [#allocation8], %s3318_s10  ;;  %s2925_s28 = scalar_lea.vmem %s2284_s0, 128 }
 0x571   : > { %p2926_p13 = scmp.ne.s32.totalorder %s2284_s0, %s2925_s28  ;;  %s3047_s20 = smov [#allocation7]  }
 0x572   : > { %s2929_s19 = sshll.u32 %s3047_s20, 4  ;;  %s2930_s19 = int_to_ptr.vmem [resolvable:$false] %s2929_s19 }
 0x573   : > { %p2927_p0 = pnand %p2926_p13, %p3155_p7  ;;  %s2931_s7 = scalar_lea.vmem %s2930_s19, 256 }
 0x574   : > { %p2932_p2 = scmp.lt.s32.totalorder %s2284_s0, %s2930_s19  ;;  %p2933_p3 = scmp.lt.s32.totalorder %s2931_s7, %s2925_s28 }
 0x575   : > { %p2928_p1 = pneg %p2927_p0 }
 0x576   : > { %p2934_p4 = por %p2933_p3, %p2932_p2 }
 0x578   : > { %p2935_p5 = pnand %p2934_p4, %p2928_p1 }
 0x57a   : > { %2938 = shalt.err (!%p2935_p5)
}
 0x57b   : > { %s2939_s23 = scalar_lea.hbm %s3998_s13, 128  ;;  %s2943_s14 = scalar_lea.hbm %s4059_s6, 256 }
 0x57c   : > { %p2940_p6 = scmp.ne.s32.totalorder %s3998_s13, %s2939_s23  ;;  %p2944_p10 = scmp.lt.u32.totalorder %s3998_s13, %s4059_s6 }
 0x57d   : > { %p2945_p11 = scmp.lt.u32.totalorder %s2943_s14, %s2939_s23  ;;  %p2947_p0 = scmp.lt.u32.totalorder %s2939_s23, %s3998_s13 }
 0x57e   : > { %p2941_p8 = pnand %p2940_p6, %p3155_p7 }
 0x57f   : > { %p2946_p13 = por %p2945_p11, %p2944_p10 }
 0x580   : > { %p2942_p9 = pneg %p2941_p8 }
 0x581   : > { %p2948_p1 = por %p2947_p0, %p2946_p13 }
 0x583   : > { %p2949_p2 = pnand %p2948_p1, %p2942_p9 }
 0x585   : > { %2952 = shalt.err (!%p2949_p2)
}
 0x586   : > { %2793 = dma.vmem_to_hbm [thread:$0]  (%p3155_p7), %s2284_s0, 128, %s3998_s13, %s2257_s25  }
 0x587 PF: > { %p2803_p3 = scmp.ge.s32.totalorder %s3039_s30, 2  ;;  %s2295_s9 = sand.u32 1, %s3003_s21  }
 0x588   : > { %s2296_s8 = scalar_lea.sflag [#allocation6], %s2295_s9 }
 0x589   : > { %p2797_p4 = pnand %p2803_p3, %p3163_p12 }
 0x58b   : > { %2994 = dma.done.wait (!%p2797_p4), %s2296_s8, 128  }
 0x58c   : > { %2996 = vsyncadd (!%p2797_p4), %s2296_s8, 4294967168  ;;  %s2305_s26 = scalar_lea.sflag [#allocation8], %s2295_s9 }
 0x58d   : > { %2998 = dma.done.wait (!%p2797_p4), %s2305_s26, 128  }
 0x58e   : > { %3000 = vsyncadd (!%p2797_p4), %s2305_s26, 4294967168  ;;  %s23_s30 = sadd.s32 1, %s3039_s30   ;;  %s4118_s15 = sld [smem:[#allocation11_spill]] }
 0x58f   : > { %p20_p5 = scmp.ge.s32.totalorder %s23_s30, 6   ;;  %s4119_s23 = sld [smem:[#allocation17_spill]] }
 0x590   : > { %s4120_s24 = sld [smem:[#allocation12_spill]]  ;;  %s4121_s25 = sld [smem:[#allocation18_spill]] }
 0x591   : > { %s4122_s26 = sld [smem:[#allocation13_spill]]  ;;  %s4123_s27 = sld [smem:[#allocation14_spill]] }
 0x592   : > { %s4124_s28 = sld [smem:[#allocation15_spill]]  ;;  %s4125_s29 = sld [smem:[#allocation16_spill]] }
 0x593   : > { %s4126_s21 = smov %s3007_s22  ;;  %22 = sbr.rel (!%p20_p5) target bundleno = 10 (0xa), region = 152 }
 0x594   : > { %s4127_s22 = smov %s4118_s15 }
 0x59a   :  { %2310 = vsyncpa [#allocation6], 1 }
 0x59b   :  { %2312 = vsyncpa [#allocation6 + $0x1], 1 }
 0x59c   :  { %2313 = vsyncpa [#allocation8], 1 }
 0x59d   :  { %2315 = vsyncpa [#allocation8 + $0x1], 1 }

</bundles_post_ra>
